<compile_context>
chip_gen: v7x
topology: tpu7x:2x2x1
jax: 0.10.0
libtpu: 0.0.40
codegen_flags: <defaults>
</compile_context>

<pallas_src>
import math
import functools

import jax
import jax.numpy as jnp
from jax.experimental import pallas as pl
from jax.experimental.pallas import tpu as pltpu


def _round_up(x, m):
    return ((x + m - 1) // m) * m


def _pad_gate_cols(mat_t, h, hp):
    """(R, 4h) -> (R, 4hp): zero-pad each of the 4 gate column blocks to hp."""
    r = mat_t.shape[0]
    g = mat_t.reshape(r, 4, h)
    g = jnp.pad(g, ((0, 0), (0, 0), (0, hp - h)))
    return g.reshape(r, 4 * hp)


def _pad_rows_blocked(mat, n_blocks, blk, blk_p):
    """(n_blocks*blk, C) -> (n_blocks*blk_p, C): zero-pad each row block."""
    c = mat.shape[1]
    r = mat.reshape(n_blocks, blk, c)
    r = jnp.pad(r, ((0, 0), (0, blk_p - blk), (0, 0)))
    return r.reshape(n_blocks * blk_p, c)


# ----------------------------------------------------------------------------
# Pallas kernel: one LSTM layer, both directions, full sequence.
# grid = (num_directions, num_time_chunks); the recurrent (h, c) state lives in
# VMEM scratch and is carried across the (sequential, "arbitrary") chunk axis.
# ----------------------------------------------------------------------------
def _lstm_layer_kernel(x_ref, wih_ref, whh_ref, b_ref, h0_ref, c0_ref,
                       out_ref, hT_ref, cT_ref,
                       gx_ref, h_sc, c_sc, *, t_chunk, hidden_p):
    d = pl.program_id(0)          # direction: 0 = forward, 1 = backward
    c = pl.program_id(1)          # time-chunk step (sequential)
    nc = pl.num_programs(1)

    T = t_chunk
    Hp = hidden_p
    Bp = x_ref.shape[1]
    Ep = x_ref.shape[2]

    @pl.when(c == 0)
    def _():
        h_sc[...] = h0_ref[0]
        c_sc[...] = c0_ref[0]

    # Hoisted input projection: one large bf16 MXU matmul for the whole chunk,
    # accumulated in f32, bias added once.  (T*Bp, Ep) @ (Ep, 4Hp).
    x2 = x_ref[...].reshape(T * Bp, Ep).astype(jnp.bfloat16)
    gx = jnp.dot(x2, wih_ref[0], preferred_element_type=jnp.float32)
    gx = gx + b_ref[0]
    gx_ref[...] = gx.reshape(T, Bp, 4 * Hp)

    whh = whh_ref[0]              # (Hp, 4Hp) bf16, resident

    def step(tt, carry):
        # Local time index inside the chunk; the backward direction walks the
        # chunk in reverse (the chunk itself is reversed via the index_map).
        lt = tt + d * (T - 1 - 2 * tt)          # == tt (fwd) / T-1-tt (bwd)
        h_prev = h_sc[...]
        c_prev = c_sc[...]
        # Only the recurrent matmul remains inside the recurrence.
        gates = gx_ref[lt] + jnp.dot(h_prev.astype(jnp.bfloat16), whh,
                                     preferred_element_type=jnp.float32)
        # Lane-aligned gate slices (Hp is a multiple of 128).
        i_g = jax.nn.sigmoid(gates[:, 0 * Hp:1 * Hp])
        f_g = jax.nn.sigmoid(gates[:, 1 * Hp:2 * Hp])
        g_g = jnp.tanh(gates[:, 2 * Hp:3 * Hp])
        o_g = jax.nn.sigmoid(gates[:, 3 * Hp:4 * Hp])
        # Cell-state math stays in f32.
        c_new = f_g * c_prev + i_g * g_g
        h_new = o_g * jnp.tanh(c_new)
        h_sc[...] = h_new
        c_sc[...] = c_new
        out_ref[lt] = h_new
        return carry

    jax.lax.fori_loop(0, T, step, 0, unroll=(T <= 32))

    @pl.when(c == nc - 1)
    def _():
        hT_ref[0] = h_sc[...]
        cT_ref[0] = c_sc[...]


def lstm_layer(x_p, wih_p, whh_p, b_p, h0_p, c0_p, *, hidden_p, t_chunk):
    """One LSTM layer (all directions fused) over the padded sequence.

    x_p   : (S, Bp, Ep)     f32, time-major, padded
    wih_p : (D, Ep, 4Hp)    bf16  (W_ih^T, per-gate column-padded)
    whh_p : (D, Hp, 4Hp)    bf16  (W_hh^T)
    b_p   : (D, 1, 4Hp)     f32   (b_ih + b_hh)
    h0_p, c0_p : (D, Bp, Hp) f32
    returns out (S, Bp, D*Hp) f32, hT (D, Bp, Hp), cT (D, Bp, Hp)
    """
    S, Bp, Ep = x_p.shape
    D = wih_p.shape[0]
    Hp = hidden_p
    nc = S // t_chunk

    kernel = functools.partial(_lstm_layer_kernel, t_chunk=t_chunk, hidden_p=Hp)

    out, hT, cT = pl.pallas_call(
        kernel,
        out_shape=(
            jax.ShapeDtypeStruct((S, Bp, D * Hp), jnp.float32),
            jax.ShapeDtypeStruct((D, Bp, Hp), jnp.float32),
            jax.ShapeDtypeStruct((D, Bp, Hp), jnp.float32),
        ),
        grid_spec=pltpu.PrefetchScalarGridSpec(
            num_scalar_prefetch=0,
            grid=(D, nc),
            in_specs=[
                # backward direction (d==1) reads chunks in reverse order
                pl.BlockSpec((t_chunk, Bp, Ep),
                             lambda d, c: (c + d * (nc - 1 - 2 * c), 0, 0)),
                pl.BlockSpec((1, Ep, 4 * Hp), lambda d, c: (d, 0, 0)),
                pl.BlockSpec((1, Hp, 4 * Hp), lambda d, c: (d, 0, 0)),
                pl.BlockSpec((1, 1, 4 * Hp), lambda d, c: (d, 0, 0)),
                pl.BlockSpec((1, Bp, Hp), lambda d, c: (d, 0, 0)),
                pl.BlockSpec((1, Bp, Hp), lambda d, c: (d, 0, 0)),
            ],
            out_specs=[
                # write each direction into its own lane-dense column block
                pl.BlockSpec((t_chunk, Bp, Hp),
                             lambda d, c: (c + d * (nc - 1 - 2 * c), 0, d)),
                pl.BlockSpec((1, Bp, Hp), lambda d, c: (d, 0, 0)),
                pl.BlockSpec((1, Bp, Hp), lambda d, c: (d, 0, 0)),
            ],
            scratch_shapes=[
                pltpu.VMEM((t_chunk, Bp, 4 * Hp), jnp.float32),  # gx chunk
                pltpu.VMEM((Bp, Hp), jnp.float32),               # h state
                pltpu.VMEM((Bp, Hp), jnp.float32),               # c state
            ],
        ),
        compiler_params=pltpu.CompilerParams(
            dimension_semantics=("parallel", "arbitrary")),
    )(x_p, wih_p, whh_p, b_p, h0_p, c0_p)
    return out, hT, cT


# ----------------------------------------------------------------------------
# Encoder module (parameter setup + padded-layout glue in plain JAX).
# ----------------------------------------------------------------------------
class EncoderPallas:
    def __init__(self, embedding_dim, hidden_dim, n_layers, dropout, bidir, key):
        self.embedding_dim = embedding_dim
        self.hidden_dim = hidden_dim // 2 if bidir else hidden_dim
        self.n_layers = n_layers
        self.num_directions = 2 if bidir else 1
        self.total_layers = n_layers * self.num_directions
        self.bidir = bidir
        self.dropout = dropout  # no-op at inference (matches nn.LSTM eval mode)

        H = self.hidden_dim
        D = self.num_directions
        Hp = _round_up(H, 128)
        self.hidden_p = Hp

        k = 1.0 / math.sqrt(H)
        self.params = []          # raw PyTorch-layout params, (layer, dir) order
        self.padded_params = []   # per-layer (wih_p, whh_p, b_p) stacked over D
        self.in_p = []            # padded input feature width per layer
        for layer in range(n_layers):
            if layer == 0:
                in_size, in_blocks, blk = embedding_dim, 1, embedding_dim
                blk_p = _round_up(embedding_dim, 128)
            else:
                in_size, in_blocks, blk, blk_p = H * D, D, H, Hp
            self.in_p.append(in_blocks * blk_p)

            wih_l, whh_l, b_l = [], [], []
            for _d in range(D):
                key, k1, k2, k3, k4 = jax.random.split(key, 5)
                w_ih = jax.random.uniform(k1, (4 * H, in_size), jnp.float32, -k, k)
                w_hh = jax.random.uniform(k2, (4 * H, H), jnp.float32, -k, k)
                b_ih = jax.random.uniform(k3, (4 * H,), jnp.float32, -k, k)
                b_hh = jax.random.uniform(k4, (4 * H,), jnp.float32, -k, k)
                self.params.append((w_ih, w_hh, b_ih, b_hh))

                wih_t = _pad_rows_blocked(_pad_gate_cols(w_ih.T, H, Hp),
                                          in_blocks, blk, blk_p).astype(jnp.bfloat16)
                whh_t = _pad_rows_blocked(_pad_gate_cols(w_hh.T, H, Hp),
                                          1, H, Hp).astype(jnp.bfloat16)
                b_pad = _pad_gate_cols((b_ih + b_hh).reshape(1, 4 * H),
                                       H, Hp).astype(jnp.float32)
                wih_l.append(wih_t)
                whh_l.append(whh_t)
                b_l.append(b_pad)
            self.padded_params.append(
                (jnp.stack(wih_l), jnp.stack(whh_l), jnp.stack(b_l)))

    def init_hidden(self, embedded_inputs):
        batch_size = embedded_inputs.shape[0]
        h0 = jnp.zeros((self.total_layers, batch_size, self.hidden_dim), jnp.float32)
        c0 = jnp.zeros((self.total_layers, batch_size, self.hidden_dim), jnp.float32)
        return (h0, c0)

    def forward(self, embedded_inputs, hidden):
        """embedded_inputs: (B, S, E); hidden = (h0, c0) each (L*D, B, H)."""
        h0_all, c0_all = hidden
        B, S, E = embedded_inputs.shape
        H = self.hidden_dim
        Hp = self.hidden_p
        D = self.num_directions
        Bp = _round_up(B, 8)

        # time chunk: largest divisor of S up to 128
        t_chunk = min(S, 128)
        while S % t_chunk:
            t_chunk -= 1

        # time-major, pad batch (sublanes) and features (lanes)
        x = jnp.transpose(embedded_inputs, (1, 0, 2)).astype(jnp.float32)
        x = jnp.pad(x, ((0, 0), (0, Bp - B), (0, self.in_p[0] - E)))

        h_finals, c_finals = [], []
        layer_in = x
        for layer in range(self.n_layers):
            wih_p, whh_p, b_p = self.padded_params[layer]
            i0 = layer * D
            h0 = jnp.pad(h0_all[i0:i0 + D].astype(jnp.float32),
                         ((0, 0), (0, Bp - B), (0, Hp - H)))
            c0 = jnp.pad(c0_all[i0:i0 + D].astype(jnp.float32),
                         ((0, 0), (0, Bp - B), (0, Hp - H)))
            out, hT, cT = lstm_layer(layer_in, wih_p, whh_p, b_p, h0, c0,
                                     hidden_p=Hp, t_chunk=t_chunk)
            layer_in = out                         # (S, Bp, D*Hp), already padded
            h_finals.append(hT[:, :B, :H])
            c_finals.append(cT[:, :B, :H])

        # strip padding: per-direction real H columns, real batch rows
        out = layer_in.reshape(S, Bp, D, Hp)[:, :B, :, :H].reshape(S, B, D * H)
        outputs = jnp.transpose(out, (1, 0, 2))    # back to (B, S, H*D)
        h_n = jnp.concatenate(h_finals, axis=0)
        c_n = jnp.concatenate(c_finals, axis=0)
        return outputs, (h_n, c_n)


# ----------------------------------------------------------------------------
# Pure-JAX reference LSTM (f32) for a correctness sanity check.
# ----------------------------------------------------------------------------
def _reference_lstm(params, x_sbE, h0_all, c0_all, n_layers, D, H):
    def run_dir(xs, w_ih, w_hh, b_ih, b_hh, h0, c0):
        def step(carry, x_t):
            h, c = carry
            g = x_t @ w_ih.T + h @ w_hh.T + b_ih + b_hh
            i = jax.nn.sigmoid(g[:, 0 * H:1 * H])
            f = jax.nn.sigmoid(g[:, 1 * H:2 * H])
            gg = jnp.tanh(g[:, 2 * H:3 * H])
            o = jax.nn.sigmoid(g[:, 3 * H:4 * H])
            c = f * c + i * gg
            h = o * jnp.tanh(c)
            return (h, c), h
        (hT, cT), ys = jax.lax.scan(step, (h0, c0), xs)
        return ys, hT, cT

    layer_in = x_sbE
    hs, cs = [], []
    for layer in range(n_layers):
        outs = []
        for d in range(D):
            idx = layer * D + d
            w_ih, w_hh, b_ih, b_hh = params[idx]
            inp = layer_in if d == 0 else layer_in[::-1]
            ys, hT, cT = run_dir(inp, w_ih, w_hh, b_ih, b_hh,
                                 h0_all[idx], c0_all[idx])
            if d == 1:
                ys = ys[::-1]
            outs.append(ys)
            hs.append(hT)
            cs.append(cT)
        layer_in = outs[0] if D == 1 else jnp.concatenate(outs, axis=-1)
    return layer_in, jnp.stack(hs, 0), jnp.stack(cs, 0)


if __name__ == "__main__":
    key = jax.random.PRNGKey(0)
    key, pkey, xkey = jax.random.split(key, 3)

    batch, seq, embedding_dim, hidden_dim = 2, 8, 32, 32
    n_layers, dropout, bidir = 2, 0.0, True

    enc = EncoderPallas(embedding_dim, hidden_dim, n_layers, dropout, bidir, pkey)

    embedded_inputs = jax.random.normal(xkey, (batch, seq, embedding_dim), jnp.float32)
    hidden0 = enc.init_hidden(embedded_inputs)

    outputs, (h_n, c_n) = enc.forward(embedded_inputs, hidden0)
    jax.block_until_ready((outputs, h_n, c_n))

    assert outputs.shape == (batch, seq, hidden_dim)
    assert h_n.shape == (n_layers * 2, batch, hidden_dim // 2)
    assert c_n.shape == (n_layers * 2, batch, hidden_dim // 2)

    # numerical sanity check vs a pure-JAX f32 LSTM (bf16 matmuls -> loose tol)
    x_sb = jnp.transpose(embedded_inputs, (1, 0, 2))
    ref_out_sb, ref_h, ref_c = _reference_lstm(
        enc.params, x_sb, hidden0[0], hidden0[1],
        n_layers, 2 if bidir else 1, enc.hidden_dim)
    ref_out = jnp.transpose(ref_out_sb, (1, 0, 2))
    assert jnp.max(jnp.abs(outputs - ref_out)) < 7.5e-2
    assert jnp.max(jnp.abs(h_n - ref_h)) < 7.5e-2
    assert jnp.max(jnp.abs(c_n - ref_c)) < 7.5e-2

    print("KERNEL_OK")
</pallas_src>

<mosaic_0001>
module attributes {stable_mosaic.version = 11 : i64} {
  func.func @_lstm_layer_kernel(%arg0: i32, %arg1: i32, %arg2: memref<8x8x128xf32, #tpu.memory_space<vmem>>, %arg3: memref<1x128x512xbf16, #tpu.memory_space<vmem>>, %arg4: memref<1x128x512xbf16, #tpu.memory_space<vmem>>, %arg5: memref<1x1x512xf32, #tpu.memory_space<vmem>>, %arg6: memref<1x8x128xf32, #tpu.memory_space<vmem>>, %arg7: memref<1x8x128xf32, #tpu.memory_space<vmem>>, %arg8: memref<8x8x128xf32, #tpu.memory_space<vmem>>, %arg9: memref<1x8x128xf32, #tpu.memory_space<vmem>>, %arg10: memref<1x8x128xf32, #tpu.memory_space<vmem>>, %arg11: memref<8x8x512xf32, #tpu.memory_space<vmem>>, %arg12: memref<8x128xf32, #tpu.memory_space<vmem>>, %arg13: memref<8x128xf32, #tpu.memory_space<vmem>>) attributes {dimension_semantics = [#tpu.dimension_semantics<parallel>, #tpu.dimension_semantics<arbitrary>], iteration_bounds = array<i64: 2, 1>, scalar_prefetch = 0 : i64, scratch_operands = 3 : i64, tpu.core_type = #tpu.core_type<tc>, window_params = [{transform_indices = @transform_0, window_bounds = array<i64: 8, 8, 128>}, {transform_indices = @transform_1, window_bounds = array<i64: 1, 128, 512>}, {transform_indices = @transform_2, window_bounds = array<i64: 1, 128, 512>}, {transform_indices = @transform_3, window_bounds = array<i64: 1, 1, 512>}, {transform_indices = @transform_4, window_bounds = array<i64: 1, 8, 128>}, {transform_indices = @transform_5, window_bounds = array<i64: 1, 8, 128>}, {transform_indices = @transform_6, window_bounds = array<i64: 8, 8, 128>}, {transform_indices = @transform_7, window_bounds = array<i64: 1, 8, 128>}, {transform_indices = @transform_8, window_bounds = array<i64: 1, 8, 128>}]} {
    %c0_i32 = arith.constant 0 : i32
    %0 = arith.cmpi eq, %arg1, %c0_i32 : i32
    %1 = arith.extui %0 : i1 to i32
    %c0_i32_0 = arith.constant 0 : i32
    %2 = arith.cmpi ne, %1, %c0_i32_0 : i32
    scf.if %2 {
      %c0_162 = arith.constant 0 : index
      %c0_163 = arith.constant 0 : index
      %c0_164 = arith.constant 0 : index
      %364 = vector.load %arg6[%c0_162, %c0_163, %c0_164] : memref<1x8x128xf32, #tpu.memory_space<vmem>>, vector<1x8x128xf32>
      %365 = vector.shape_cast %364 : vector<1x8x128xf32> to vector<8x128xf32>
      %c0_165 = arith.constant 0 : index
      %c0_166 = arith.constant 0 : index
      %366 = vector.load %arg12[%c0_165, %c0_166] : memref<8x128xf32, #tpu.memory_space<vmem>>, vector<8x128xf32>
      tpu.vector_store %arg12[%c0_165, %c0_166], %365 {strides = array<i32>} : memref<8x128xf32, #tpu.memory_space<vmem>>, vector<8x128xf32>,
      %c0_167 = arith.constant 0 : index
      %c0_168 = arith.constant 0 : index
      %c0_169 = arith.constant 0 : index
      %367 = vector.load %arg7[%c0_167, %c0_168, %c0_169] : memref<1x8x128xf32, #tpu.memory_space<vmem>>, vector<1x8x128xf32>
      %368 = vector.shape_cast %367 : vector<1x8x128xf32> to vector<8x128xf32>
      %c0_170 = arith.constant 0 : index
      %c0_171 = arith.constant 0 : index
      %369 = vector.load %arg13[%c0_170, %c0_171] : memref<8x128xf32, #tpu.memory_space<vmem>>, vector<8x128xf32>
      tpu.vector_store %arg13[%c0_170, %c0_171], %368 {strides = array<i32>} : memref<8x128xf32, #tpu.memory_space<vmem>>, vector<8x128xf32>,
    } else {
    }
    %c0 = arith.constant 0 : index
    %c0_1 = arith.constant 0 : index
    %c0_2 = arith.constant 0 : index
    %3 = vector.load %arg2[%c0, %c0_1, %c0_2] : memref<8x8x128xf32, #tpu.memory_space<vmem>>, vector<8x8x128xf32>
    %4 = vector.shape_cast %3 : vector<8x8x128xf32> to vector<64x128xf32>
    %5 = arith.truncf %4 : vector<64x128xf32> to vector<64x128xbf16>
    %c0_3 = arith.constant 0 : index
    %c0_4 = arith.constant 0 : index
    %c0_5 = arith.constant 0 : index
    %6 = vector.load %arg3[%c0_3, %c0_4, %c0_5] : memref<1x128x512xbf16, #tpu.memory_space<vmem>>, vector<1x128x512xbf16>
    %7 = vector.shape_cast %6 : vector<1x128x512xbf16> to vector<128x512xbf16>
    %cst = arith.constant dense<0.000000e+00> : vector<64x512xf32>
    %8 = tpu.matmul %5, %7, %cst {dimension_numbers = #tpu.dot_dimension_numbers<[1], [0], [0], [1], [0, 0, 1, 1], [], []>} : vector<64x128xbf16>, vector<128x512xbf16>, vector<64x512xf32> -> vector<64x512xf32>
    %c0_6 = arith.constant 0 : index
    %c0_7 = arith.constant 0 : index
    %c0_8 = arith.constant 0 : index
    %9 = vector.load %arg5[%c0_6, %c0_7, %c0_8] : memref<1x1x512xf32, #tpu.memory_space<vmem>>, vector<1x1x512xf32>
    %10 = vector.shape_cast %9 : vector<1x1x512xf32> to vector<1x512xf32>
    %11 = vector.broadcast %10 : vector<1x512xf32> to vector<64x512xf32>
    %12 = arith.addf %8, %11 : vector<64x512xf32>
    %13 = vector.shape_cast %12 : vector<64x512xf32> to vector<8x8x512xf32>
    %c0_9 = arith.constant 0 : index
    %c0_10 = arith.constant 0 : index
    %c0_11 = arith.constant 0 : index
    %14 = vector.load %arg11[%c0_9, %c0_10, %c0_11] : memref<8x8x512xf32, #tpu.memory_space<vmem>>, vector<8x8x512xf32>
    tpu.vector_store %arg11[%c0_9, %c0_10, %c0_11], %13 {strides = array<i32>} : memref<8x8x512xf32, #tpu.memory_space<vmem>>, vector<8x8x512xf32>,
    %c0_12 = arith.constant 0 : index
    %c0_13 = arith.constant 0 : index
    %c0_14 = arith.constant 0 : index
    %15 = vector.load %arg4[%c0_12, %c0_13, %c0_14] : memref<1x128x512xbf16, #tpu.memory_space<vmem>>, vector<1x128x512xbf16>
    %16 = vector.shape_cast %15 : vector<1x128x512xbf16> to vector<128x512xbf16>
    %c0_i32_15 = arith.constant 0 : i32
    %c2_i32 = arith.constant 2 : i32
    %17 = arith.muli %c2_i32, %c0_i32_15 : i32
    %c7_i32 = arith.constant 7 : i32
    %18 = arith.subi %c7_i32, %17 : i32
    %19 = arith.muli %arg0, %18 : i32
    %20 = arith.addi %c0_i32_15, %19 : i32
    %c0_16 = arith.constant 0 : index
    %c0_17 = arith.constant 0 : index
    %21 = vector.load %arg12[%c0_16, %c0_17] : memref<8x128xf32, #tpu.memory_space<vmem>>, vector<8x128xf32>
    %c0_18 = arith.constant 0 : index
    %c0_19 = arith.constant 0 : index
    %22 = vector.load %arg13[%c0_18, %c0_19] : memref<8x128xf32, #tpu.memory_space<vmem>>, vector<8x128xf32>
    %23 = arith.index_cast %20 : i32 to index
    %c0_20 = arith.constant 0 : index
    %c0_21 = arith.constant 0 : index
    %24 = vector.load %arg11[%23, %c0_20, %c0_21] : memref<8x8x512xf32, #tpu.memory_space<vmem>>, vector<1x8x512xf32>
    %25 = vector.shape_cast %24 : vector<1x8x512xf32> to vector<8x512xf32>
    %26 = arith.truncf %21 : vector<8x128xf32> to vector<8x128xbf16>
    %cst_22 = arith.constant dense<0.000000e+00> : vector<8x512xf32>
    %27 = tpu.matmul %26, %16, %cst_22 {dimension_numbers = #tpu.dot_dimension_numbers<[1], [0], [0], [1], [0, 0, 1, 1], [], []>} : vector<8x128xbf16>, vector<128x512xbf16>, vector<8x512xf32> -> vector<8x512xf32>
    %28 = arith.addf %25, %27 : vector<8x512xf32>
    %29 = vector.extract_strided_slice %28 {offsets = [0, 0], sizes = [8, 128], strides = [1, 1]} : vector<8x512xf32> to vector<8x128xf32>
    %30 = arith.negf %29 : vector<8x128xf32>
    %31 = math.exp %30 : vector<8x128xf32>
    %cst_23 = arith.constant 1.000000e+00 : f32
    %32 = vector.broadcast %cst_23 : f32 to vector<8x128xf32>
    %33 = arith.addf %32, %31 : vector<8x128xf32>
    %34 = arith.divf %32, %33 : vector<8x128xf32>
    %35 = vector.extract_strided_slice %28 {offsets = [0, 128], sizes = [8, 128], strides = [1, 1]} : vector<8x512xf32> to vector<8x128xf32>
    %36 = arith.negf %35 : vector<8x128xf32>
    %37 = math.exp %36 : vector<8x128xf32>
    %cst_24 = arith.constant 1.000000e+00 : f32
    %38 = vector.broadcast %cst_24 : f32 to vector<8x128xf32>
    %39 = arith.addf %38, %37 : vector<8x128xf32>
    %40 = arith.divf %38, %39 : vector<8x128xf32>
    %41 = vector.extract_strided_slice %28 {offsets = [0, 256], sizes = [8, 128], strides = [1, 1]} : vector<8x512xf32> to vector<8x128xf32>
    %42 = math.tanh %41 : vector<8x128xf32>
    %43 = vector.extract_strided_slice %28 {offsets = [0, 384], sizes = [8, 128], strides = [1, 1]} : vector<8x512xf32> to vector<8x128xf32>
    %44 = arith.negf %43 : vector<8x128xf32>
    %45 = math.exp %44 : vector<8x128xf32>
    %cst_25 = arith.constant 1.000000e+00 : f32
    %46 = vector.broadcast %cst_25 : f32 to vector<8x128xf32>
    %47 = arith.addf %46, %45 : vector<8x128xf32>
    %48 = arith.divf %46, %47 : vector<8x128xf32>
    %49 = arith.mulf %40, %22 : vector<8x128xf32>
    %50 = arith.mulf %34, %42 : vector<8x128xf32>
    %51 = arith.addf %49, %50 : vector<8x128xf32>
    %52 = math.tanh %51 : vector<8x128xf32>
    %53 = arith.mulf %48, %52 : vector<8x128xf32>
    %c0_26 = arith.constant 0 : index
    %c0_27 = arith.constant 0 : index
    %54 = vector.load %arg12[%c0_26, %c0_27] : memref<8x128xf32, #tpu.memory_space<vmem>>, vector<8x128xf32>
    tpu.vector_store %arg12[%c0_26, %c0_27], %53 {strides = array<i32>} : memref<8x128xf32, #tpu.memory_space<vmem>>, vector<8x128xf32>,
    %c0_28 = arith.constant 0 : index
    %c0_29 = arith.constant 0 : index
    %55 = vector.load %arg13[%c0_28, %c0_29] : memref<8x128xf32, #tpu.memory_space<vmem>>, vector<8x128xf32>
    tpu.vector_store %arg13[%c0_28, %c0_29], %51 {strides = array<i32>} : memref<8x128xf32, #tpu.memory_space<vmem>>, vector<8x128xf32>,
    %56 = arith.index_cast %20 : i32 to index
    %c0_30 = arith.constant 0 : index
    %c0_31 = arith.constant 0 : index
    %57 = vector.load %arg8[%56, %c0_30, %c0_31] : memref<8x8x128xf32, #tpu.memory_space<vmem>>, vector<1x8x128xf32>
    %58 = vector.shape_cast %57 : vector<1x8x128xf32> to vector<8x128xf32>
    %59 = vector.shape_cast %53 : vector<8x128xf32> to vector<1x8x128xf32>
    tpu.vector_store %arg8[%56, %c0_30, %c0_31], %59 {strides = array<i32>} : memref<8x8x128xf32, #tpu.memory_space<vmem>>, vector<1x8x128xf32>,
    %c1_i32 = arith.constant 1 : i32
    %c2_i32_32 = arith.constant 2 : i32
    %60 = arith.muli %c2_i32_32, %c1_i32 : i32
    %c7_i32_33 = arith.constant 7 : i32
    %61 = arith.subi %c7_i32_33, %60 : i32
    %62 = arith.muli %arg0, %61 : i32
    %63 = arith.addi %c1_i32, %62 : i32
    %c0_34 = arith.constant 0 : index
    %c0_35 = arith.constant 0 : index
    %64 = vector.load %arg12[%c0_34, %c0_35] : memref<8x128xf32, #tpu.memory_space<vmem>>, vector<8x128xf32>
    %c0_36 = arith.constant 0 : index
    %c0_37 = arith.constant 0 : index
    %65 = vector.load %arg13[%c0_36, %c0_37] : memref<8x128xf32, #tpu.memory_space<vmem>>, vector<8x128xf32>
    %66 = arith.index_cast %63 : i32 to index
    %c0_38 = arith.constant 0 : index
    %c0_39 = arith.constant 0 : index
    %67 = vector.load %arg11[%66, %c0_38, %c0_39] : memref<8x8x512xf32, #tpu.memory_space<vmem>>, vector<1x8x512xf32>
    %68 = vector.shape_cast %67 : vector<1x8x512xf32> to vector<8x512xf32>
    %69 = arith.truncf %64 : vector<8x128xf32> to vector<8x128xbf16>
    %cst_40 = arith.constant dense<0.000000e+00> : vector<8x512xf32>
    %70 = tpu.matmul %69, %16, %cst_40 {dimension_numbers = #tpu.dot_dimension_numbers<[1], [0], [0], [1], [0, 0, 1, 1], [], []>} : vector<8x128xbf16>, vector<128x512xbf16>, vector<8x512xf32> -> vector<8x512xf32>
    %71 = arith.addf %68, %70 : vector<8x512xf32>
    %72 = vector.extract_strided_slice %71 {offsets = [0, 0], sizes = [8, 128], strides = [1, 1]} : vector<8x512xf32> to vector<8x128xf32>
    %73 = arith.negf %72 : vector<8x128xf32>
    %74 = math.exp %73 : vector<8x128xf32>
    %cst_41 = arith.constant 1.000000e+00 : f32
    %75 = vector.broadcast %cst_41 : f32 to vector<8x128xf32>
    %76 = arith.addf %75, %74 : vector<8x128xf32>
    %77 = arith.divf %75, %76 : vector<8x128xf32>
    %78 = vector.extract_strided_slice %71 {offsets = [0, 128], sizes = [8, 128], strides = [1, 1]} : vector<8x512xf32> to vector<8x128xf32>
    %79 = arith.negf %78 : vector<8x128xf32>
    %80 = math.exp %79 : vector<8x128xf32>
    %cst_42 = arith.constant 1.000000e+00 : f32
    %81 = vector.broadcast %cst_42 : f32 to vector<8x128xf32>
    %82 = arith.addf %81, %80 : vector<8x128xf32>
    %83 = arith.divf %81, %82 : vector<8x128xf32>
    %84 = vector.extract_strided_slice %71 {offsets = [0, 256], sizes = [8, 128], strides = [1, 1]} : vector<8x512xf32> to vector<8x128xf32>
    %85 = math.tanh %84 : vector<8x128xf32>
    %86 = vector.extract_strided_slice %71 {offsets = [0, 384], sizes = [8, 128], strides = [1, 1]} : vector<8x512xf32> to vector<8x128xf32>
    %87 = arith.negf %86 : vector<8x128xf32>
    %88 = math.exp %87 : vector<8x128xf32>
    %cst_43 = arith.constant 1.000000e+00 : f32
    %89 = vector.broadcast %cst_43 : f32 to vector<8x128xf32>
    %90 = arith.addf %89, %88 : vector<8x128xf32>
    %91 = arith.divf %89, %90 : vector<8x128xf32>
    %92 = arith.mulf %83, %65 : vector<8x128xf32>
    %93 = arith.mulf %77, %85 : vector<8x128xf32>
    %94 = arith.addf %92, %93 : vector<8x128xf32>
    %95 = math.tanh %94 : vector<8x128xf32>
    %96 = arith.mulf %91, %95 : vector<8x128xf32>
    %c0_44 = arith.constant 0 : index
    %c0_45 = arith.constant 0 : index
    %97 = vector.load %arg12[%c0_44, %c0_45] : memref<8x128xf32, #tpu.memory_space<vmem>>, vector<8x128xf32>
    tpu.vector_store %arg12[%c0_44, %c0_45], %96 {strides = array<i32>} : memref<8x128xf32, #tpu.memory_space<vmem>>, vector<8x128xf32>,
    %c0_46 = arith.constant 0 : index
    %c0_47 = arith.constant 0 : index
    %98 = vector.load %arg13[%c0_46, %c0_47] : memref<8x128xf32, #tpu.memory_space<vmem>>, vector<8x128xf32>
    tpu.vector_store %arg13[%c0_46, %c0_47], %94 {strides = array<i32>} : memref<8x128xf32, #tpu.memory_space<vmem>>, vector<8x128xf32>,
    %99 = arith.index_cast %63 : i32 to index
    %c0_48 = arith.constant 0 : index
    %c0_49 = arith.constant 0 : index
    %100 = vector.load %arg8[%99, %c0_48, %c0_49] : memref<8x8x128xf32, #tpu.memory_space<vmem>>, vector<1x8x128xf32>
    %101 = vector.shape_cast %100 : vector<1x8x128xf32> to vector<8x128xf32>
    %102 = vector.shape_cast %96 : vector<8x128xf32> to vector<1x8x128xf32>
    tpu.vector_store %arg8[%99, %c0_48, %c0_49], %102 {strides = array<i32>} : memref<8x8x128xf32, #tpu.memory_space<vmem>>, vector<1x8x128xf32>,
    %c2_i32_50 = arith.constant 2 : i32
    %c2_i32_51 = arith.constant 2 : i32
    %103 = arith.muli %c2_i32_51, %c2_i32_50 : i32
    %c7_i32_52 = arith.constant 7 : i32
    %104 = arith.subi %c7_i32_52, %103 : i32
    %105 = arith.muli %arg0, %104 : i32
    %106 = arith.addi %c2_i32_50, %105 : i32
    %c0_53 = arith.constant 0 : index
    %c0_54 = arith.constant 0 : index
    %107 = vector.load %arg12[%c0_53, %c0_54] : memref<8x128xf32, #tpu.memory_space<vmem>>, vector<8x128xf32>
    %c0_55 = arith.constant 0 : index
    %c0_56 = arith.constant 0 : index
    %108 = vector.load %arg13[%c0_55, %c0_56] : memref<8x128xf32, #tpu.memory_space<vmem>>, vector<8x128xf32>
    %109 = arith.index_cast %106 : i32 to index
    %c0_57 = arith.constant 0 : index
    %c0_58 = arith.constant 0 : index
    %110 = vector.load %arg11[%109, %c0_57, %c0_58] : memref<8x8x512xf32, #tpu.memory_space<vmem>>, vector<1x8x512xf32>
    %111 = vector.shape_cast %110 : vector<1x8x512xf32> to vector<8x512xf32>
    %112 = arith.truncf %107 : vector<8x128xf32> to vector<8x128xbf16>
    %cst_59 = arith.constant dense<0.000000e+00> : vector<8x512xf32>
    %113 = tpu.matmul %112, %16, %cst_59 {dimension_numbers = #tpu.dot_dimension_numbers<[1], [0], [0], [1], [0, 0, 1, 1], [], []>} : vector<8x128xbf16>, vector<128x512xbf16>, vector<8x512xf32> -> vector<8x512xf32>
    %114 = arith.addf %111, %113 : vector<8x512xf32>
    %115 = vector.extract_strided_slice %114 {offsets = [0, 0], sizes = [8, 128], strides = [1, 1]} : vector<8x512xf32> to vector<8x128xf32>
    %116 = arith.negf %115 : vector<8x128xf32>
    %117 = math.exp %116 : vector<8x128xf32>
    %cst_60 = arith.constant 1.000000e+00 : f32
    %118 = vector.broadcast %cst_60 : f32 to vector<8x128xf32>
    %119 = arith.addf %118, %117 : vector<8x128xf32>
    %120 = arith.divf %118, %119 : vector<8x128xf32>
    %121 = vector.extract_strided_slice %114 {offsets = [0, 128], sizes = [8, 128], strides = [1, 1]} : vector<8x512xf32> to vector<8x128xf32>
    %122 = arith.negf %121 : vector<8x128xf32>
    %123 = math.exp %122 : vector<8x128xf32>
    %cst_61 = arith.constant 1.000000e+00 : f32
    %124 = vector.broadcast %cst_61 : f32 to vector<8x128xf32>
    %125 = arith.addf %124, %123 : vector<8x128xf32>
    %126 = arith.divf %124, %125 : vector<8x128xf32>
    %127 = vector.extract_strided_slice %114 {offsets = [0, 256], sizes = [8, 128], strides = [1, 1]} : vector<8x512xf32> to vector<8x128xf32>
    %128 = math.tanh %127 : vector<8x128xf32>
    %129 = vector.extract_strided_slice %114 {offsets = [0, 384], sizes = [8, 128], strides = [1, 1]} : vector<8x512xf32> to vector<8x128xf32>
    %130 = arith.negf %129 : vector<8x128xf32>
    %131 = math.exp %130 : vector<8x128xf32>
    %cst_62 = arith.constant 1.000000e+00 : f32
    %132 = vector.broadcast %cst_62 : f32 to vector<8x128xf32>
    %133 = arith.addf %132, %131 : vector<8x128xf32>
    %134 = arith.divf %132, %133 : vector<8x128xf32>
    %135 = arith.mulf %126, %108 : vector<8x128xf32>
    %136 = arith.mulf %120, %128 : vector<8x128xf32>
    %137 = arith.addf %135, %136 : vector<8x128xf32>
    %138 = math.tanh %137 : vector<8x128xf32>
    %139 = arith.mulf %134, %138 : vector<8x128xf32>
    %c0_63 = arith.constant 0 : index
    %c0_64 = arith.constant 0 : index
    %140 = vector.load %arg12[%c0_63, %c0_64] : memref<8x128xf32, #tpu.memory_space<vmem>>, vector<8x128xf32>
    tpu.vector_store %arg12[%c0_63, %c0_64], %139 {strides = array<i32>} : memref<8x128xf32, #tpu.memory_space<vmem>>, vector<8x128xf32>,
    %c0_65 = arith.constant 0 : index
    %c0_66 = arith.constant 0 : index
    %141 = vector.load %arg13[%c0_65, %c0_66] : memref<8x128xf32, #tpu.memory_space<vmem>>, vector<8x128xf32>
    tpu.vector_store %arg13[%c0_65, %c0_66], %137 {strides = array<i32>} : memref<8x128xf32, #tpu.memory_space<vmem>>, vector<8x128xf32>,
    %142 = arith.index_cast %106 : i32 to index
    %c0_67 = arith.constant 0 : index
    %c0_68 = arith.constant 0 : index
    %143 = vector.load %arg8[%142, %c0_67, %c0_68] : memref<8x8x128xf32, #tpu.memory_space<vmem>>, vector<1x8x128xf32>
    %144 = vector.shape_cast %143 : vector<1x8x128xf32> to vector<8x128xf32>
    %145 = vector.shape_cast %139 : vector<8x128xf32> to vector<1x8x128xf32>
    tpu.vector_store %arg8[%142, %c0_67, %c0_68], %145 {strides = array<i32>} : memref<8x8x128xf32, #tpu.memory_space<vmem>>, vector<1x8x128xf32>,
    %c3_i32 = arith.constant 3 : i32
    %c2_i32_69 = arith.constant 2 : i32
    %146 = arith.muli %c2_i32_69, %c3_i32 : i32
    %c7_i32_70 = arith.constant 7 : i32
    %147 = arith.subi %c7_i32_70, %146 : i32
    %148 = arith.muli %arg0, %147 : i32
    %149 = arith.addi %c3_i32, %148 : i32
    %c0_71 = arith.constant 0 : index
    %c0_72 = arith.constant 0 : index
    %150 = vector.load %arg12[%c0_71, %c0_72] : memref<8x128xf32, #tpu.memory_space<vmem>>, vector<8x128xf32>
    %c0_73 = arith.constant 0 : index
    %c0_74 = arith.constant 0 : index
    %151 = vector.load %arg13[%c0_73, %c0_74] : memref<8x128xf32, #tpu.memory_space<vmem>>, vector<8x128xf32>
    %152 = arith.index_cast %149 : i32 to index
    %c0_75 = arith.constant 0 : index
    %c0_76 = arith.constant 0 : index
    %153 = vector.load %arg11[%152, %c0_75, %c0_76] : memref<8x8x512xf32, #tpu.memory_space<vmem>>, vector<1x8x512xf32>
    %154 = vector.shape_cast %153 : vector<1x8x512xf32> to vector<8x512xf32>
    %155 = arith.truncf %150 : vector<8x128xf32> to vector<8x128xbf16>
    %cst_77 = arith.constant dense<0.000000e+00> : vector<8x512xf32>
    %156 = tpu.matmul %155, %16, %cst_77 {dimension_numbers = #tpu.dot_dimension_numbers<[1], [0], [0], [1], [0, 0, 1, 1], [], []>} : vector<8x128xbf16>, vector<128x512xbf16>, vector<8x512xf32> -> vector<8x512xf32>
    %157 = arith.addf %154, %156 : vector<8x512xf32>
    %158 = vector.extract_strided_slice %157 {offsets = [0, 0], sizes = [8, 128], strides = [1, 1]} : vector<8x512xf32> to vector<8x128xf32>
    %159 = arith.negf %158 : vector<8x128xf32>
    %160 = math.exp %159 : vector<8x128xf32>
    %cst_78 = arith.constant 1.000000e+00 : f32
    %161 = vector.broadcast %cst_78 : f32 to vector<8x128xf32>
    %162 = arith.addf %161, %160 : vector<8x128xf32>
    %163 = arith.divf %161, %162 : vector<8x128xf32>
    %164 = vector.extract_strided_slice %157 {offsets = [0, 128], sizes = [8, 128], strides = [1, 1]} : vector<8x512xf32> to vector<8x128xf32>
    %165 = arith.negf %164 : vector<8x128xf32>
    %166 = math.exp %165 : vector<8x128xf32>
    %cst_79 = arith.constant 1.000000e+00 : f32
    %167 = vector.broadcast %cst_79 : f32 to vector<8x128xf32>
    %168 = arith.addf %167, %166 : vector<8x128xf32>
    %169 = arith.divf %167, %168 : vector<8x128xf32>
    %170 = vector.extract_strided_slice %157 {offsets = [0, 256], sizes = [8, 128], strides = [1, 1]} : vector<8x512xf32> to vector<8x128xf32>
    %171 = math.tanh %170 : vector<8x128xf32>
    %172 = vector.extract_strided_slice %157 {offsets = [0, 384], sizes = [8, 128], strides = [1, 1]} : vector<8x512xf32> to vector<8x128xf32>
    %173 = arith.negf %172 : vector<8x128xf32>
    %174 = math.exp %173 : vector<8x128xf32>
    %cst_80 = arith.constant 1.000000e+00 : f32
    %175 = vector.broadcast %cst_80 : f32 to vector<8x128xf32>
    %176 = arith.addf %175, %174 : vector<8x128xf32>
    %177 = arith.divf %175, %176 : vector<8x128xf32>
    %178 = arith.mulf %169, %151 : vector<8x128xf32>
    %179 = arith.mulf %163, %171 : vector<8x128xf32>
    %180 = arith.addf %178, %179 : vector<8x128xf32>
    %181 = math.tanh %180 : vector<8x128xf32>
    %182 = arith.mulf %177, %181 : vector<8x128xf32>
    %c0_81 = arith.constant 0 : index
    %c0_82 = arith.constant 0 : index
    %183 = vector.load %arg12[%c0_81, %c0_82] : memref<8x128xf32, #tpu.memory_space<vmem>>, vector<8x128xf32>
    tpu.vector_store %arg12[%c0_81, %c0_82], %182 {strides = array<i32>} : memref<8x128xf32, #tpu.memory_space<vmem>>, vector<8x128xf32>,
    %c0_83 = arith.constant 0 : index
    %c0_84 = arith.constant 0 : index
    %184 = vector.load %arg13[%c0_83, %c0_84] : memref<8x128xf32, #tpu.memory_space<vmem>>, vector<8x128xf32>
    tpu.vector_store %arg13[%c0_83, %c0_84], %180 {strides = array<i32>} : memref<8x128xf32, #tpu.memory_space<vmem>>, vector<8x128xf32>,
    %185 = arith.index_cast %149 : i32 to index
    %c0_85 = arith.constant 0 : index
    %c0_86 = arith.constant 0 : index
    %186 = vector.load %arg8[%185, %c0_85, %c0_86] : memref<8x8x128xf32, #tpu.memory_space<vmem>>, vector<1x8x128xf32>
    %187 = vector.shape_cast %186 : vector<1x8x128xf32> to vector<8x128xf32>
    %188 = vector.shape_cast %182 : vector<8x128xf32> to vector<1x8x128xf32>
    tpu.vector_store %arg8[%185, %c0_85, %c0_86], %188 {strides = array<i32>} : memref<8x8x128xf32, #tpu.memory_space<vmem>>, vector<1x8x128xf32>,
    %c4_i32 = arith.constant 4 : i32
    %c2_i32_87 = arith.constant 2 : i32
    %189 = arith.muli %c2_i32_87, %c4_i32 : i32
    %c7_i32_88 = arith.constant 7 : i32
    %190 = arith.subi %c7_i32_88, %189 : i32
    %191 = arith.muli %arg0, %190 : i32
    %192 = arith.addi %c4_i32, %191 : i32
    %c0_89 = arith.constant 0 : index
    %c0_90 = arith.constant 0 : index
    %193 = vector.load %arg12[%c0_89, %c0_90] : memref<8x128xf32, #tpu.memory_space<vmem>>, vector<8x128xf32>
    %c0_91 = arith.constant 0 : index
    %c0_92 = arith.constant 0 : index
    %194 = vector.load %arg13[%c0_91, %c0_92] : memref<8x128xf32, #tpu.memory_space<vmem>>, vector<8x128xf32>
    %195 = arith.index_cast %192 : i32 to index
    %c0_93 = arith.constant 0 : index
    %c0_94 = arith.constant 0 : index
    %196 = vector.load %arg11[%195, %c0_93, %c0_94] : memref<8x8x512xf32, #tpu.memory_space<vmem>>, vector<1x8x512xf32>
    %197 = vector.shape_cast %196 : vector<1x8x512xf32> to vector<8x512xf32>
    %198 = arith.truncf %193 : vector<8x128xf32> to vector<8x128xbf16>
    %cst_95 = arith.constant dense<0.000000e+00> : vector<8x512xf32>
    %199 = tpu.matmul %198, %16, %cst_95 {dimension_numbers = #tpu.dot_dimension_numbers<[1], [0], [0], [1], [0, 0, 1, 1], [], []>} : vector<8x128xbf16>, vector<128x512xbf16>, vector<8x512xf32> -> vector<8x512xf32>
    %200 = arith.addf %197, %199 : vector<8x512xf32>
    %201 = vector.extract_strided_slice %200 {offsets = [0, 0], sizes = [8, 128], strides = [1, 1]} : vector<8x512xf32> to vector<8x128xf32>
    %202 = arith.negf %201 : vector<8x128xf32>
    %203 = math.exp %202 : vector<8x128xf32>
    %cst_96 = arith.constant 1.000000e+00 : f32
    %204 = vector.broadcast %cst_96 : f32 to vector<8x128xf32>
    %205 = arith.addf %204, %203 : vector<8x128xf32>
    %206 = arith.divf %204, %205 : vector<8x128xf32>
    %207 = vector.extract_strided_slice %200 {offsets = [0, 128], sizes = [8, 128], strides = [1, 1]} : vector<8x512xf32> to vector<8x128xf32>
    %208 = arith.negf %207 : vector<8x128xf32>
    %209 = math.exp %208 : vector<8x128xf32>
    %cst_97 = arith.constant 1.000000e+00 : f32
    %210 = vector.broadcast %cst_97 : f32 to vector<8x128xf32>
    %211 = arith.addf %210, %209 : vector<8x128xf32>
    %212 = arith.divf %210, %211 : vector<8x128xf32>
    %213 = vector.extract_strided_slice %200 {offsets = [0, 256], sizes = [8, 128], strides = [1, 1]} : vector<8x512xf32> to vector<8x128xf32>
    %214 = math.tanh %213 : vector<8x128xf32>
    %215 = vector.extract_strided_slice %200 {offsets = [0, 384], sizes = [8, 128], strides = [1, 1]} : vector<8x512xf32> to vector<8x128xf32>
    %216 = arith.negf %215 : vector<8x128xf32>
    %217 = math.exp %216 : vector<8x128xf32>
    %cst_98 = arith.constant 1.000000e+00 : f32
    %218 = vector.broadcast %cst_98 : f32 to vector<8x128xf32>
    %219 = arith.addf %218, %217 : vector<8x128xf32>
    %220 = arith.divf %218, %219 : vector<8x128xf32>
    %221 = arith.mulf %212, %194 : vector<8x128xf32>
    %222 = arith.mulf %206, %214 : vector<8x128xf32>
    %223 = arith.addf %221, %222 : vector<8x128xf32>
    %224 = math.tanh %223 : vector<8x128xf32>
    %225 = arith.mulf %220, %224 : vector<8x128xf32>
    %c0_99 = arith.constant 0 : index
    %c0_100 = arith.constant 0 : index
    %226 = vector.load %arg12[%c0_99, %c0_100] : memref<8x128xf32, #tpu.memory_space<vmem>>, vector<8x128xf32>
    tpu.vector_store %arg12[%c0_99, %c0_100], %225 {strides = array<i32>} : memref<8x128xf32, #tpu.memory_space<vmem>>, vector<8x128xf32>,
    %c0_101 = arith.constant 0 : index
    %c0_102 = arith.constant 0 : index
    %227 = vector.load %arg13[%c0_101, %c0_102] : memref<8x128xf32, #tpu.memory_space<vmem>>, vector<8x128xf32>
    tpu.vector_store %arg13[%c0_101, %c0_102], %223 {strides = array<i32>} : memref<8x128xf32, #tpu.memory_space<vmem>>, vector<8x128xf32>,
    %228 = arith.index_cast %192 : i32 to index
    %c0_103 = arith.constant 0 : index
    %c0_104 = arith.constant 0 : index
    %229 = vector.load %arg8[%228, %c0_103, %c0_104] : memref<8x8x128xf32, #tpu.memory_space<vmem>>, vector<1x8x128xf32>
    %230 = vector.shape_cast %229 : vector<1x8x128xf32> to vector<8x128xf32>
    %231 = vector.shape_cast %225 : vector<8x128xf32> to vector<1x8x128xf32>
    tpu.vector_store %arg8[%228, %c0_103, %c0_104], %231 {strides = array<i32>} : memref<8x8x128xf32, #tpu.memory_space<vmem>>, vector<1x8x128xf32>,
    %c5_i32 = arith.constant 5 : i32
    %c2_i32_105 = arith.constant 2 : i32
    %232 = arith.muli %c2_i32_105, %c5_i32 : i32
    %c7_i32_106 = arith.constant 7 : i32
    %233 = arith.subi %c7_i32_106, %232 : i32
    %234 = arith.muli %arg0, %233 : i32
    %235 = arith.addi %c5_i32, %234 : i32
    %c0_107 = arith.constant 0 : index
    %c0_108 = arith.constant 0 : index
    %236 = vector.load %arg12[%c0_107, %c0_108] : memref<8x128xf32, #tpu.memory_space<vmem>>, vector<8x128xf32>
    %c0_109 = arith.constant 0 : index
    %c0_110 = arith.constant 0 : index
    %237 = vector.load %arg13[%c0_109, %c0_110] : memref<8x128xf32, #tpu.memory_space<vmem>>, vector<8x128xf32>
    %238 = arith.index_cast %235 : i32 to index
    %c0_111 = arith.constant 0 : index
    %c0_112 = arith.constant 0 : index
    %239 = vector.load %arg11[%238, %c0_111, %c0_112] : memref<8x8x512xf32, #tpu.memory_space<vmem>>, vector<1x8x512xf32>
    %240 = vector.shape_cast %239 : vector<1x8x512xf32> to vector<8x512xf32>
    %241 = arith.truncf %236 : vector<8x128xf32> to vector<8x128xbf16>
    %cst_113 = arith.constant dense<0.000000e+00> : vector<8x512xf32>
    %242 = tpu.matmul %241, %16, %cst_113 {dimension_numbers = #tpu.dot_dimension_numbers<[1], [0], [0], [1], [0, 0, 1, 1], [], []>} : vector<8x128xbf16>, vector<128x512xbf16>, vector<8x512xf32> -> vector<8x512xf32>
    %243 = arith.addf %240, %242 : vector<8x512xf32>
    %244 = vector.extract_strided_slice %243 {offsets = [0, 0], sizes = [8, 128], strides = [1, 1]} : vector<8x512xf32> to vector<8x128xf32>
    %245 = arith.negf %244 : vector<8x128xf32>
    %246 = math.exp %245 : vector<8x128xf32>
    %cst_114 = arith.constant 1.000000e+00 : f32
    %247 = vector.broadcast %cst_114 : f32 to vector<8x128xf32>
    %248 = arith.addf %247, %246 : vector<8x128xf32>
    %249 = arith.divf %247, %248 : vector<8x128xf32>
    %250 = vector.extract_strided_slice %243 {offsets = [0, 128], sizes = [8, 128], strides = [1, 1]} : vector<8x512xf32> to vector<8x128xf32>
    %251 = arith.negf %250 : vector<8x128xf32>
    %252 = math.exp %251 : vector<8x128xf32>
    %cst_115 = arith.constant 1.000000e+00 : f32
    %253 = vector.broadcast %cst_115 : f32 to vector<8x128xf32>
    %254 = arith.addf %253, %252 : vector<8x128xf32>
    %255 = arith.divf %253, %254 : vector<8x128xf32>
    %256 = vector.extract_strided_slice %243 {offsets = [0, 256], sizes = [8, 128], strides = [1, 1]} : vector<8x512xf32> to vector<8x128xf32>
    %257 = math.tanh %256 : vector<8x128xf32>
    %258 = vector.extract_strided_slice %243 {offsets = [0, 384], sizes = [8, 128], strides = [1, 1]} : vector<8x512xf32> to vector<8x128xf32>
    %259 = arith.negf %258 : vector<8x128xf32>
    %260 = math.exp %259 : vector<8x128xf32>
    %cst_116 = arith.constant 1.000000e+00 : f32
    %261 = vector.broadcast %cst_116 : f32 to vector<8x128xf32>
    %262 = arith.addf %261, %260 : vector<8x128xf32>
    %263 = arith.divf %261, %262 : vector<8x128xf32>
    %264 = arith.mulf %255, %237 : vector<8x128xf32>
    %265 = arith.mulf %249, %257 : vector<8x128xf32>
    %266 = arith.addf %264, %265 : vector<8x128xf32>
    %267 = math.tanh %266 : vector<8x128xf32>
    %268 = arith.mulf %263, %267 : vector<8x128xf32>
    %c0_117 = arith.constant 0 : index
    %c0_118 = arith.constant 0 : index
    %269 = vector.load %arg12[%c0_117, %c0_118] : memref<8x128xf32, #tpu.memory_space<vmem>>, vector<8x128xf32>
    tpu.vector_store %arg12[%c0_117, %c0_118], %268 {strides = array<i32>} : memref<8x128xf32, #tpu.memory_space<vmem>>, vector<8x128xf32>,
    %c0_119 = arith.constant 0 : index
    %c0_120 = arith.constant 0 : index
    %270 = vector.load %arg13[%c0_119, %c0_120] : memref<8x128xf32, #tpu.memory_space<vmem>>, vector<8x128xf32>
    tpu.vector_store %arg13[%c0_119, %c0_120], %266 {strides = array<i32>} : memref<8x128xf32, #tpu.memory_space<vmem>>, vector<8x128xf32>,
    %271 = arith.index_cast %235 : i32 to index
    %c0_121 = arith.constant 0 : index
    %c0_122 = arith.constant 0 : index
    %272 = vector.load %arg8[%271, %c0_121, %c0_122] : memref<8x8x128xf32, #tpu.memory_space<vmem>>, vector<1x8x128xf32>
    %273 = vector.shape_cast %272 : vector<1x8x128xf32> to vector<8x128xf32>
    %274 = vector.shape_cast %268 : vector<8x128xf32> to vector<1x8x128xf32>
    tpu.vector_store %arg8[%271, %c0_121, %c0_122], %274 {strides = array<i32>} : memref<8x8x128xf32, #tpu.memory_space<vmem>>, vector<1x8x128xf32>,
    %c6_i32 = arith.constant 6 : i32
    %c2_i32_123 = arith.constant 2 : i32
    %275 = arith.muli %c2_i32_123, %c6_i32 : i32
    %c7_i32_124 = arith.constant 7 : i32
    %276 = arith.subi %c7_i32_124, %275 : i32
    %277 = arith.muli %arg0, %276 : i32
    %278 = arith.addi %c6_i32, %277 : i32
    %c0_125 = arith.constant 0 : index
    %c0_126 = arith.constant 0 : index
    %279 = vector.load %arg12[%c0_125, %c0_126] : memref<8x128xf32, #tpu.memory_space<vmem>>, vector<8x128xf32>
    %c0_127 = arith.constant 0 : index
    %c0_128 = arith.constant 0 : index
    %280 = vector.load %arg13[%c0_127, %c0_128] : memref<8x128xf32, #tpu.memory_space<vmem>>, vector<8x128xf32>
    %281 = arith.index_cast %278 : i32 to index
    %c0_129 = arith.constant 0 : index
    %c0_130 = arith.constant 0 : index
    %282 = vector.load %arg11[%281, %c0_129, %c0_130] : memref<8x8x512xf32, #tpu.memory_space<vmem>>, vector<1x8x512xf32>
    %283 = vector.shape_cast %282 : vector<1x8x512xf32> to vector<8x512xf32>
    %284 = arith.truncf %279 : vector<8x128xf32> to vector<8x128xbf16>
    %cst_131 = arith.constant dense<0.000000e+00> : vector<8x512xf32>
    %285 = tpu.matmul %284, %16, %cst_131 {dimension_numbers = #tpu.dot_dimension_numbers<[1], [0], [0], [1], [0, 0, 1, 1], [], []>} : vector<8x128xbf16>, vector<128x512xbf16>, vector<8x512xf32> -> vector<8x512xf32>
    %286 = arith.addf %283, %285 : vector<8x512xf32>
    %287 = vector.extract_strided_slice %286 {offsets = [0, 0], sizes = [8, 128], strides = [1, 1]} : vector<8x512xf32> to vector<8x128xf32>
    %288 = arith.negf %287 : vector<8x128xf32>
    %289 = math.exp %288 : vector<8x128xf32>
    %cst_132 = arith.constant 1.000000e+00 : f32
    %290 = vector.broadcast %cst_132 : f32 to vector<8x128xf32>
    %291 = arith.addf %290, %289 : vector<8x128xf32>
    %292 = arith.divf %290, %291 : vector<8x128xf32>
    %293 = vector.extract_strided_slice %286 {offsets = [0, 128], sizes = [8, 128], strides = [1, 1]} : vector<8x512xf32> to vector<8x128xf32>
    %294 = arith.negf %293 : vector<8x128xf32>
    %295 = math.exp %294 : vector<8x128xf32>
    %cst_133 = arith.constant 1.000000e+00 : f32
    %296 = vector.broadcast %cst_133 : f32 to vector<8x128xf32>
    %297 = arith.addf %296, %295 : vector<8x128xf32>
    %298 = arith.divf %296, %297 : vector<8x128xf32>
    %299 = vector.extract_strided_slice %286 {offsets = [0, 256], sizes = [8, 128], strides = [1, 1]} : vector<8x512xf32> to vector<8x128xf32>
    %300 = math.tanh %299 : vector<8x128xf32>
    %301 = vector.extract_strided_slice %286 {offsets = [0, 384], sizes = [8, 128], strides = [1, 1]} : vector<8x512xf32> to vector<8x128xf32>
    %302 = arith.negf %301 : vector<8x128xf32>
    %303 = math.exp %302 : vector<8x128xf32>
    %cst_134 = arith.constant 1.000000e+00 : f32
    %304 = vector.broadcast %cst_134 : f32 to vector<8x128xf32>
    %305 = arith.addf %304, %303 : vector<8x128xf32>
    %306 = arith.divf %304, %305 : vector<8x128xf32>
    %307 = arith.mulf %298, %280 : vector<8x128xf32>
    %308 = arith.mulf %292, %300 : vector<8x128xf32>
    %309 = arith.addf %307, %308 : vector<8x128xf32>
    %310 = math.tanh %309 : vector<8x128xf32>
    %311 = arith.mulf %306, %310 : vector<8x128xf32>
    %c0_135 = arith.constant 0 : index
    %c0_136 = arith.constant 0 : index
    %312 = vector.load %arg12[%c0_135, %c0_136] : memref<8x128xf32, #tpu.memory_space<vmem>>, vector<8x128xf32>
    tpu.vector_store %arg12[%c0_135, %c0_136], %311 {strides = array<i32>} : memref<8x128xf32, #tpu.memory_space<vmem>>, vector<8x128xf32>,
    %c0_137 = arith.constant 0 : index
    %c0_138 = arith.constant 0 : index
    %313 = vector.load %arg13[%c0_137, %c0_138] : memref<8x128xf32, #tpu.memory_space<vmem>>, vector<8x128xf32>
    tpu.vector_store %arg13[%c0_137, %c0_138], %309 {strides = array<i32>} : memref<8x128xf32, #tpu.memory_space<vmem>>, vector<8x128xf32>,
    %314 = arith.index_cast %278 : i32 to index
    %c0_139 = arith.constant 0 : index
    %c0_140 = arith.constant 0 : index
    %315 = vector.load %arg8[%314, %c0_139, %c0_140] : memref<8x8x128xf32, #tpu.memory_space<vmem>>, vector<1x8x128xf32>
    %316 = vector.shape_cast %315 : vector<1x8x128xf32> to vector<8x128xf32>
    %317 = vector.shape_cast %311 : vector<8x128xf32> to vector<1x8x128xf32>
    tpu.vector_store %arg8[%314, %c0_139, %c0_140], %317 {strides = array<i32>} : memref<8x8x128xf32, #tpu.memory_space<vmem>>, vector<1x8x128xf32>,
    %c7_i32_141 = arith.constant 7 : i32
    %c2_i32_142 = arith.constant 2 : i32
    %318 = arith.muli %c2_i32_142, %c7_i32_141 : i32
    %c7_i32_143 = arith.constant 7 : i32
    %319 = arith.subi %c7_i32_143, %318 : i32
    %320 = arith.muli %arg0, %319 : i32
    %321 = arith.addi %c7_i32_141, %320 : i32
    %c0_144 = arith.constant 0 : index
    %c0_145 = arith.constant 0 : index
    %322 = vector.load %arg12[%c0_144, %c0_145] : memref<8x128xf32, #tpu.memory_space<vmem>>, vector<8x128xf32>
    %c0_146 = arith.constant 0 : index
    %c0_147 = arith.constant 0 : index
    %323 = vector.load %arg13[%c0_146, %c0_147] : memref<8x128xf32, #tpu.memory_space<vmem>>, vector<8x128xf32>
    %324 = arith.index_cast %321 : i32 to index
    %c0_148 = arith.constant 0 : index
    %c0_149 = arith.constant 0 : index
    %325 = vector.load %arg11[%324, %c0_148, %c0_149] : memref<8x8x512xf32, #tpu.memory_space<vmem>>, vector<1x8x512xf32>
    %326 = vector.shape_cast %325 : vector<1x8x512xf32> to vector<8x512xf32>
    %327 = arith.truncf %322 : vector<8x128xf32> to vector<8x128xbf16>
    %cst_150 = arith.constant dense<0.000000e+00> : vector<8x512xf32>
    %328 = tpu.matmul %327, %16, %cst_150 {dimension_numbers = #tpu.dot_dimension_numbers<[1], [0], [0], [1], [0, 0, 1, 1], [], []>} : vector<8x128xbf16>, vector<128x512xbf16>, vector<8x512xf32> -> vector<8x512xf32>
    %329 = arith.addf %326, %328 : vector<8x512xf32>
    %330 = vector.extract_strided_slice %329 {offsets = [0, 0], sizes = [8, 128], strides = [1, 1]} : vector<8x512xf32> to vector<8x128xf32>
    %331 = arith.negf %330 : vector<8x128xf32>
    %332 = math.exp %331 : vector<8x128xf32>
    %cst_151 = arith.constant 1.000000e+00 : f32
    %333 = vector.broadcast %cst_151 : f32 to vector<8x128xf32>
    %334 = arith.addf %333, %332 : vector<8x128xf32>
    %335 = arith.divf %333, %334 : vector<8x128xf32>
    %336 = vector.extract_strided_slice %329 {offsets = [0, 128], sizes = [8, 128], strides = [1, 1]} : vector<8x512xf32> to vector<8x128xf32>
    %337 = arith.negf %336 : vector<8x128xf32>
    %338 = math.exp %337 : vector<8x128xf32>
    %cst_152 = arith.constant 1.000000e+00 : f32
    %339 = vector.broadcast %cst_152 : f32 to vector<8x128xf32>
    %340 = arith.addf %339, %338 : vector<8x128xf32>
    %341 = arith.divf %339, %340 : vector<8x128xf32>
    %342 = vector.extract_strided_slice %329 {offsets = [0, 256], sizes = [8, 128], strides = [1, 1]} : vector<8x512xf32> to vector<8x128xf32>
    %343 = math.tanh %342 : vector<8x128xf32>
    %344 = vector.extract_strided_slice %329 {offsets = [0, 384], sizes = [8, 128], strides = [1, 1]} : vector<8x512xf32> to vector<8x128xf32>
    %345 = arith.negf %344 : vector<8x128xf32>
    %346 = math.exp %345 : vector<8x128xf32>
    %cst_153 = arith.constant 1.000000e+00 : f32
    %347 = vector.broadcast %cst_153 : f32 to vector<8x128xf32>
    %348 = arith.addf %347, %346 : vector<8x128xf32>
    %349 = arith.divf %347, %348 : vector<8x128xf32>
    %350 = arith.mulf %341, %323 : vector<8x128xf32>
    %351 = arith.mulf %335, %343 : vector<8x128xf32>
    %352 = arith.addf %350, %351 : vector<8x128xf32>
    %353 = math.tanh %352 : vector<8x128xf32>
    %354 = arith.mulf %349, %353 : vector<8x128xf32>
    %c0_154 = arith.constant 0 : index
    %c0_155 = arith.constant 0 : index
    %355 = vector.load %arg12[%c0_154, %c0_155] : memref<8x128xf32, #tpu.memory_space<vmem>>, vector<8x128xf32>
    tpu.vector_store %arg12[%c0_154, %c0_155], %354 {strides = array<i32>} : memref<8x128xf32, #tpu.memory_space<vmem>>, vector<8x128xf32>,
    %c0_156 = arith.constant 0 : index
    %c0_157 = arith.constant 0 : index
    %356 = vector.load %arg13[%c0_156, %c0_157] : memref<8x128xf32, #tpu.memory_space<vmem>>, vector<8x128xf32>
    tpu.vector_store %arg13[%c0_156, %c0_157], %352 {strides = array<i32>} : memref<8x128xf32, #tpu.memory_space<vmem>>, vector<8x128xf32>,
    %357 = arith.index_cast %321 : i32 to index
    %c0_158 = arith.constant 0 : index
    %c0_159 = arith.constant 0 : index
    %358 = vector.load %arg8[%357, %c0_158, %c0_159] : memref<8x8x128xf32, #tpu.memory_space<vmem>>, vector<1x8x128xf32>
    %359 = vector.shape_cast %358 : vector<1x8x128xf32> to vector<8x128xf32>
    %360 = vector.shape_cast %354 : vector<8x128xf32> to vector<1x8x128xf32>
    tpu.vector_store %arg8[%357, %c0_158, %c0_159], %360 {strides = array<i32>} : memref<8x8x128xf32, #tpu.memory_space<vmem>>, vector<1x8x128xf32>,
    %c8_i32 = arith.constant 8 : i32
    %c0_i32_160 = arith.constant 0 : i32
    %361 = arith.cmpi eq, %arg1, %c0_i32_160 : i32
    %362 = arith.extui %361 : i1 to i32
    %c0_i32_161 = arith.constant 0 : i32
    %363 = arith.cmpi ne, %362, %c0_i32_161 : i32
    scf.if %363 {
      %c0_162 = arith.constant 0 : index
      %c0_163 = arith.constant 0 : index
      %364 = vector.load %arg12[%c0_162, %c0_163] : memref<8x128xf32, #tpu.memory_space<vmem>>, vector<8x128xf32>
      %c0_164 = arith.constant 0 : index
      %c0_165 = arith.constant 0 : index
      %c0_166 = arith.constant 0 : index
      %365 = vector.load %arg9[%c0_164, %c0_165, %c0_166] : memref<1x8x128xf32, #tpu.memory_space<vmem>>, vector<1x8x128xf32>
      %366 = vector.shape_cast %365 : vector<1x8x128xf32> to vector<8x128xf32>
      %367 = vector.shape_cast %364 : vector<8x128xf32> to vector<1x8x128xf32>
      tpu.vector_store %arg9[%c0_164, %c0_165, %c0_166], %367 {strides = array<i32>} : memref<1x8x128xf32, #tpu.memory_space<vmem>>, vector<1x8x128xf32>,
      %c0_167 = arith.constant 0 : index
      %c0_168 = arith.constant 0 : index
      %368 = vector.load %arg13[%c0_167, %c0_168] : memref<8x128xf32, #tpu.memory_space<vmem>>, vector<8x128xf32>
      %c0_169 = arith.constant 0 : index
      %c0_170 = arith.constant 0 : index
      %c0_171 = arith.constant 0 : index
      %369 = vector.load %arg10[%c0_169, %c0_170, %c0_171] : memref<1x8x128xf32, #tpu.memory_space<vmem>>, vector<1x8x128xf32>
      %370 = vector.shape_cast %369 : vector<1x8x128xf32> to vector<8x128xf32>
      %371 = vector.shape_cast %368 : vector<8x128xf32> to vector<1x8x128xf32>
      tpu.vector_store %arg10[%c0_169, %c0_170, %c0_171], %371 {strides = array<i32>} : memref<1x8x128xf32, #tpu.memory_space<vmem>>, vector<1x8x128xf32>,
    } else {
    }
    return
  }
  func.func @transform_0(%arg0: i32, %arg1: i32) -> (i32, i32, i32) {
    %c2_i32 = arith.constant 2 : i32
    %0 = arith.muli %c2_i32, %arg1 : i32
    %c0_i32 = arith.constant 0 : i32
    %1 = arith.subi %c0_i32, %0 : i32
    %2 = arith.muli %arg0, %1 : i32
    %3 = arith.addi %arg1, %2 : i32
    %c0_i32_0 = arith.constant 0 : i32
    %c0_i32_1 = arith.constant 0 : i32
    %c0_i32_2 = arith.constant 0 : i32
    return %3, %c0_i32_0, %c0_i32_1 : i32, i32, i32
  }
  func.func @transform_1(%arg0: i32, %arg1: i32) -> (i32, i32, i32) {
    %c0_i32 = arith.constant 0 : i32
    %c0_i32_0 = arith.constant 0 : i32
    %c0_i32_1 = arith.constant 0 : i32
    return %arg0, %c0_i32, %c0_i32_0 : i32, i32, i32
  }
  func.func @transform_2(%arg0: i32, %arg1: i32) -> (i32, i32, i32) {
    %c0_i32 = arith.constant 0 : i32
    %c0_i32_0 = arith.constant 0 : i32
    %c0_i32_1 = arith.constant 0 : i32
    return %arg0, %c0_i32, %c0_i32_0 : i32, i32, i32
  }
  func.func @transform_3(%arg0: i32, %arg1: i32) -> (i32, i32, i32) {
    %c0_i32 = arith.constant 0 : i32
    %c0_i32_0 = arith.constant 0 : i32
    %c0_i32_1 = arith.constant 0 : i32
    return %arg0, %c0_i32, %c0_i32_0 : i32, i32, i32
  }
  func.func @transform_4(%arg0: i32, %arg1: i32) -> (i32, i32, i32) {
    %c0_i32 = arith.constant 0 : i32
    %c0_i32_0 = arith.constant 0 : i32
    %c0_i32_1 = arith.constant 0 : i32
    return %arg0, %c0_i32, %c0_i32_0 : i32, i32, i32
  }
  func.func @transform_5(%arg0: i32, %arg1: i32) -> (i32, i32, i32) {
    %c0_i32 = arith.constant 0 : i32
    %c0_i32_0 = arith.constant 0 : i32
    %c0_i32_1 = arith.constant 0 : i32
    return %arg0, %c0_i32, %c0_i32_0 : i32, i32, i32
  }
  func.func @transform_6(%arg0: i32, %arg1: i32) -> (i32, i32, i32) {
    %c2_i32 = arith.constant 2 : i32
    %0 = arith.muli %c2_i32, %arg1 : i32
    %c0_i32 = arith.constant 0 : i32
    %1 = arith.subi %c0_i32, %0 : i32
    %2 = arith.muli %arg0, %1 : i32
    %3 = arith.addi %arg1, %2 : i32
    %c0_i32_0 = arith.constant 0 : i32
    %c0_i32_1 = arith.constant 0 : i32
    return %3, %c0_i32_0, %arg0 : i32, i32, i32
  }
  func.func @transform_7(%arg0: i32, %arg1: i32) -> (i32, i32, i32) {
    %c0_i32 = arith.constant 0 : i32
    %c0_i32_0 = arith.constant 0 : i32
    %c0_i32_1 = arith.constant 0 : i32
    return %arg0, %c0_i32, %c0_i32_0 : i32, i32, i32
  }
  func.func @transform_8(%arg0: i32, %arg1: i32) -> (i32, i32, i32) {
    %c0_i32 = arith.constant 0 : i32
    %c0_i32_0 = arith.constant 0 : i32
    %c0_i32_1 = arith.constant 0 : i32
    return %arg0, %c0_i32, %c0_i32_0 : i32, i32, i32
  }
}

</mosaic_0001>

<bundles_post_ra>
// kernel: tpu_custom_call.1
= control target key start
LH: loop header
LB: loop body
LE: loop exit
PB: predicated region body
PF: predicated region fallthrough
CT: control target
= control target key end

     0   :  { %s4441_s0 = inlined_call_operand.hbm [shape: f32[8,8,128], index: 0, kind: input, shape index: {}]   ;;  %s4442_s1 = inlined_call_operand.hbm [shape: bf16[2,128,512], index: 1, kind: input, shape index: {}]   ;;  %s4443_s2 = inlined_call_operand.hbm [shape: bf16[2,128,512], index: 2, kind: input, shape index: {}]   ;;  %s4444_s3 = inlined_call_operand.hbm [shape: f32[2,1,512], index: 3, kind: input, shape index: {}]   ;;  %s4445_s4 = inlined_call_operand.hbm [shape: f32[2,8,128], index: 4, kind: input, shape index: {}]   ;;  %s4446_s5 = inlined_call_operand.vmem [shape: f32[2,8,128], index: 5, kind: input, shape index: {}]   ;;  %s4447_s6 = inlined_call_operand.hbm [shape: f32[8,8,256], index: 6, kind: output, shape index: {0}]   ;;  %s4448_s7 = inlined_call_operand.hbm [shape: f32[2,8,128], index: 7, kind: output, shape index: {1}]   ;;  %s4449_s8 = inlined_call_operand.hbm [shape: f32[2,8,128], index: 8, kind: output, shape index: {2}]  }
   0x1   :  { %4472 = sst [smem:[#allocation29_spill]] %s4442_s1 }
   0x2   :  { %4473 = sst [smem:[#allocation30_spill]] %s4444_s3 }
   0x3   :  { %4474 = sst [smem:[#allocation31_spill]] %s4448_s7 }
   0x4   :  { %4475 = sst [smem:[#allocation32_spill]] %s4449_s8 }
   0x5   :  { %14 = vsyncpa [#allocation6], 0 }
   0x6   :  { %16 = vsyncpa [#allocation6 + $0x1], 0 }
   0x7   :  { %17 = vsyncpa [#allocation9], 0 }
   0x8   :  { %19 = vsyncpa [#allocation9 + $0x1], 0 }
   0x9   :  { %20 = vsyncpa [#allocation12], 0 }
   0xa   :  { %22 = vsyncpa [#allocation12 + $0x1], 0 }
   0xb   :  { %23 = vsyncpa [#allocation7], 0 }
   0xc   :  { %25 = vsyncpa [#allocation7 + $0x1], 0 }
   0xd   :  { %26 = vsyncpa [#allocation16], 0 }
   0xe   :  { %28 = vsyncpa [#allocation16 + $0x1], 0  ;;  %s3428_s27 = smov 0   ;;  %s3430_s28 = smov 0  }
   0xf   :  { %s3432_s29 = smov 0   ;;  %s3434_s30 = smov 0  }
  0x10   :  { %s3436_s9 = smov 0   ;;  %s3438_s10 = smov 0  }
  0x11 LB: > { %4476 = sst [smem:[#allocation23_spill]] %s3345_s27  ;;  %s3459_s11 = sadd.s32 4294967295, %s3365_s10   ;;  %s3365_s10 = sphi %s3438_s10, %s34_s10   ;;  %s3361_s9 = sphi %s3436_s9, %s4523_s9   ;;  %s3357_s30 = sphi %s3434_s30, %s4522_s30   ;;  %s3353_s29 = sphi %s3432_s29, %s4518_s29   ;;  %s3349_s28 = sphi %s3430_s28, %s4521_s28   ;;  %s3345_s27 = sphi %s3428_s27, %s4520_s27  }
  0x12   : > { %4477 = sst [smem:[#allocation24_spill]] %s3353_s29  ;;  %s4450_s12 = sadd.s32 4294967294, %s3365_s10  }
  0x13   : > { %s46_s13 = sadd.s32 1, %s3361_s9  ;;  %s87_s14 = sadd.s32 1, %s3353_s29 }
  0x14   : > { %p48_p0 = scmp.ge.s32.totalorder %s46_s13, 2  ;;  %p94_p1 = scmp.ne.s32.totalorder %s3353_s29, %s3349_s28 }
  0x15   : > { %p4457_p2 = scmp.eq.s32.totalorder %s3365_s10, 0  ;;  %p100_p3 = scmp.ne.s32.totalorder %s3349_s28, %s3345_s27 }
  0x16   : > { %s4525_s13 = smov (%p48_p0, %s46_s13), 0  ;;  %p4455_p5 = scmp.eq.s32.totalorder %s3459_s11, 0 }
  0x17   : > { %4478 = sst [smem:[#allocation25_spill]] %s4525_s13  ;;  %p3473_p4 = por %p4457_p2, %p94_p1 }
  0x18   : > { %s84_s16 = ssub.s32 %s3361_s9, %s4525_s13  ;;  %p238_p6 = scmp.eq.s32.totalorder %s3459_s11, 1 }
  0x19   : > { %p85_p7 = scmp.eq.s32.totalorder %s84_s16, 0  ;;  %p3483_p8 = por %p4455_p5, %p100_p3 }
  0x1a   : > { %p3487_p9 = por %p238_p6, %p94_p1  ;;  %p244_p10 = scmp.eq.s32.totalorder %s4450_s12, 1 }
  0x1b   : > { %s4480_s17 = scalar_select %p3483_p8, 1, 0 }
  0x1c   : > { %s4481_s18 = scalar_select %p3487_p9, 1, 0 }
  0x1d   : > { %s3494_s19 = scalar_select %p85_p7, %s3353_s29, %s87_s14  }
  0x1e   : > { %4482 = sst [smem:[#allocation26_spill]] %s4481_s18  ;;  %p3496_p11 = por %p244_p10, %p100_p3 }
  0x1f   : > { %4483 = sst [smem:[#allocation27_spill]] %s3494_s19  ;;  %p4456_p13 = scmp.lt.s32.totalorder %s3365_s10, 2 }
  0x20   : > { %s4484_s20 = scalar_select %p3496_p11, 1, 0 }
  0x21   : > { %s3504_s22 = sand.u32 1, %s3353_s29   ;;  %s4452_s24 = sshll.u32 %s3361_s9, 12 }
  0x22   : > { %4485 = sst [smem:[#allocation28_spill]] %s4484_s20  ;;  %s4453_s23 = sshll.u32 %s3504_s22, 8 }
  0x23   : > { %s4486_s1 = sld [smem:[#allocation29_spill]]  ;;  %s345_s14 = scalar_lea.vmem [#allocation8], %s4453_s23 }
  0x24   : > { %s352_s12 = sshll.u32 %s345_s14, 4  ;;  %p3523_p0 = pnand %p4456_p13, %p3473_p4  ;;  %s3517_s12 = int_to_ptr.vmem [resolvable:$true] %s352_s12 }
  0x25   : > { %s4488_s13 = sand.u32 1, %s3365_s10  }
  0x26   : > { %s4487_s21 = scalar_select %p3523_p0, 1, 0 }
  0x27   : > { %s3529_s25 = scalar_lea.sflag [#allocation9], %s4488_s13  ;;  %p3535_p3 = pneg %p3523_p0 }
  0x29   : > { %s3513_s16 = scalar_lea.hbm %s4486_s1, %s4452_s24  ;;  %s3072_s23 = scalar_lea.hbm %s4486_s1, 8192 }
  0x2a   : > { %s3067_s26 = scalar_lea.hbm %s3513_s16, 4096  ;;  %p3073_p4 = scmp.lt.u32.totalorder %s3513_s16, %s4486_s1 }
  0x2b   : > { %p3068_p1 = scmp.ne.s32.totalorder %s3513_s16, %s3067_s26  ;;  %p3074_p10 = scmp.lt.u32.totalorder %s3072_s23, %s3067_s26 }
  0x2c   : > { %s4489_s24 = scalar_select %p3535_p3, 1, 0 }
  0x2d   : > { %p3070_p6 = pnand %p3535_p3, %p3068_p1  ;;  %p3075_p12 = por %p3074_p10, %p3073_p4 }
  0x2e   : > { %p3076_p5 = scmp.lt.u32.totalorder %s3067_s26, %s3513_s16 }
  0x2f   : > { %p3071_p7 = pneg %p3070_p6 }
  0x30   : > { %p3077_p13 = por %p3076_p5, %p3075_p12 }
  0x32   : > { %p3078_p2 = pnand %p3077_p13, %p3071_p7 }
  0x34   : > { %3081 = shalt.err (!%p3078_p2)
}
  0x35   : > { %s3082_s13 = scalar_lea.vmem %s3517_s12, 4096  ;;  %s3367_s15 = smov [#allocation8]  }
  0x36   : > { %p3083_p1 = scmp.ne.s32.totalorder %s3517_s12, %s3082_s13  ;;  %s3087_s14 = sshll.u32 %s3367_s15, 4  ;;  %s3088_s14 = int_to_ptr.vmem [resolvable:$false] %s3087_s14 }
  0x37   : > { %s3089_s29 = scalar_lea.vmem %s3088_s14, 8192  ;;  %p3090_p9 = scmp.lt.s32.totalorder %s3517_s12, %s3088_s14 }
  0x38   : > { %p3085_p6 = pnand %p3083_p1, %p3535_p3  ;;  %p3091_p8 = scmp.lt.s32.totalorder %s3089_s29, %s3082_s13 }
  0x3a   : > { %p3086_p11 = pneg %p3085_p6  ;;  %p3092_p4 = por %p3091_p8, %p3090_p9 }
  0x3c   : > { %p3093_p10 = pnand %p3092_p4, %p3086_p11 }
  0x3e   : > { %3096 = shalt.err (!%p3093_p10)
}
  0x3f   : > { %s4464_s19 = smov 256   ;;  %s4465_s23 = smov 16  }
  0x40   : > { %2730 = dma.hbm_to_vmem [thread:$0]  (!%p3523_p0), %s3513_s16, 4096, %s3517_s12, %s3529_s25, %s4464_s19, %s4464_s19, %s4465_s23  }
  0x41   : > { %s4490_s26 = sshll.u32 %s3361_s9, 12  ;;  %s4491_s29 = sshll.u32 %s3504_s22, 8 }
  0x42   : > { %s3567_s14 = scalar_lea.hbm %s4443_s2, %s4490_s26  ;;  %s366_s1 = scalar_lea.vmem [#allocation10], %s4491_s29 }
  0x43   : > { %s373_s20 = sshll.u32 %s366_s1, 4  ;;  %p2547_p2 = scmp.ge.s32.totalorder %s3365_s10, 1  ;;  %s3571_s20 = int_to_ptr.vmem [resolvable:$true] %s373_s20 }
  0x44   : > { %p425_p5 = scmp.lt.s32.totalorder %s3365_s10, 3  ;;  %s2542_s27 = sshll.u32 %s3504_s22, 2 }
  0x45   : > { %s2703_s8 = sshll.u32 %s3361_s9, 6  ;;  %s4493_s3 = sld [smem:[#allocation30_spill]] }
  0x46   : > { %p3577_p8 = pnand %p2547_p2, %p425_p5  ;;  %s387_s1 = scalar_lea.vmem [#allocation11], %s2542_s27 }
  0x47   : > { %s395_s26 = sshll.u32 %s387_s1, 4  ;;  %s4494_s15 = sand.u32 1, %s3365_s10   ;;  %s396_s26 = int_to_ptr.vmem [resolvable:$true] %s395_s26 }
  0x48   : > { %s4492_s7 = scalar_select %p3577_p8, 1, 0 }
  0x49   : > { %s3588_s29 = scalar_lea.sflag [#allocation12], %s4494_s15 }
  0x4b   : > { %s3584_s13 = scalar_lea.hbm %s4493_s3, %s2703_s8  ;;  %s3102_s8 = scalar_lea.hbm %s4493_s3, 128 }
  0x4c   : > { %s3097_s19 = scalar_lea.hbm %s3584_s13, 64  ;;  %p3103_p13 = scmp.lt.u32.totalorder %s3584_s13, %s4493_s3 }
  0x4d   : > { %p3098_p9 = scmp.ne.s32.totalorder %s3584_s13, %s3097_s19  ;;  %p3104_p7 = scmp.lt.u32.totalorder %s3102_s8, %s3097_s19 }
  0x4e   : > { %p3106_p6 = scmp.lt.u32.totalorder %s3097_s19, %s3584_s13 }
  0x4f   : > { %p3100_p11 = pnand %p3098_p9, %p3535_p3  ;;  %p3105_p1 = por %p3104_p7, %p3103_p13 }
  0x51   : > { %p3101_p12 = pneg %p3100_p11  ;;  %p3107_p4 = por %p3106_p6, %p3105_p1 }
  0x53   : > { %p3108_p10 = pnand %p3107_p4, %p3101_p12 }
  0x55   : > { %3111 = shalt.err (!%p3108_p10)
}
  0x56   : > { %s3112_s27 = scalar_lea.vmem %s396_s26, 64  ;;  %s3370_s1 = smov [#allocation11]  }
  0x57   : > { %p3113_p2 = scmp.ne.s32.totalorder %s396_s26, %s3112_s27  ;;  %s3117_s15 = sshll.u32 %s3370_s1, 4  ;;  %s3118_s15 = int_to_ptr.vmem [resolvable:$false] %s3117_s15 }
  0x58   : > { %s3119_s18 = scalar_lea.vmem %s3118_s15, 128  ;;  %p3120_p11 = scmp.lt.s32.totalorder %s396_s26, %s3118_s15 }
  0x59   : > { %p3115_p5 = pnand %p3113_p2, %p3535_p3  ;;  %p3121_p8 = scmp.lt.s32.totalorder %s3119_s18, %s3112_s27 }
  0x5b   : > { %p3116_p9 = pneg %p3115_p5  ;;  %p3122_p0 = por %p3121_p8, %p3120_p11 }
  0x5d   : > { %p3123_p7 = pnand %p3122_p0, %p3116_p9 }
  0x5f   : > { %3126 = shalt.err (!%p3123_p7)
}
  0x60   : > { %p4495_p13 = scmp.ne.s32.totalorder %s4487_s21, 0  ;;  %s3371_s19 = smov [#allocation5]  }
  0x61   : > { %s331_s23 = sshll.u32 %s3371_s19, 4  ;;  %p4496_p12 = scmp.eq.s32.totalorder %s3365_s10, 0  ;;  %s332_s23 = int_to_ptr.vmem [resolvable:$true] %s331_s23 }
  0x62   : > { %2736 = dma.hbm_to_vmem [thread:$0]  (!%p4495_p13), %s3584_s13, 64, %s396_s26, %s3588_s29  }
  0x63   : > { %p4497_p1 = scmp.lt.s32.totalorder %s3365_s10, 2  ;;  %s3127_s27 = scalar_lea.hbm %s4441_s0, 1024 }
  0x64   : > { %p3128_p0 = scmp.ne.s32.totalorder %s4441_s0, %s3127_s27  ;;  %p3134_p2 = scmp.lt.u32.totalorder %s3127_s27, %s4441_s0 }
  0x65   : > { %p3612_p6 = pnand %p4497_p1, %p4496_p12 }
  0x67   : > { %p3129_p8 = pneg %p3612_p6 }
  0x69   : > { %p3130_p4 = pnand %p3129_p8, %p3128_p0 }
  0x6b   : > { %p3131_p10 = pneg %p3130_p4 }
  0x6d   : > { %p3136_p5 = pnand %p3134_p2, %p3131_p10 }
  0x6f   : > { %3139 = shalt.err (!%p3136_p5)
}
  0x70   : > { %s3140_s18 = scalar_lea.vmem %s332_s23, 1024  ;;  %s3147_s19 = scalar_lea.vmem %s332_s23, 2048 }
  0x71   : > { %p3141_p9 = scmp.ne.s32.totalorder %s332_s23, %s3140_s18  ;;  %p3148_p12 = scmp.lt.s32.totalorder %s332_s23, %s332_s23 }
  0x72   : > { %p3149_p1 = scmp.lt.s32.totalorder %s3147_s19, %s3140_s18 }
  0x73   : > { %p3143_p11 = pnand %p3141_p9, %p3129_p8 }
  0x74   : > { %p3150_p13 = por %p3149_p1, %p3148_p12 }
  0x75   : > { %p3144_p7 = pneg %p3143_p11 }
  0x77   : > { %p3151_p3 = pnand %p3150_p13, %p3144_p7 }
  0x79   : > { %3154 = shalt.err (!%p3151_p3)
}
  0x7a   : > { %s3372_s12 = smov 128   ;;  %s3373_s16 = smov 8  }
  0x7b   : > { %2727 = dma.hbm_to_vmem [thread:$0]  (!%p3612_p6), %s4441_s0, 1024, %s332_s23, [#allocation6], %s3372_s12, %s3372_s12, %s3373_s16  }
  0x7c   : > { %s3155_s15 = scalar_lea.hbm %s3567_s14, 4096  ;;  %p4499_p8 = scmp.ne.s32.totalorder %s4489_s24, 0 }
  0x7d   : > { %p3156_p0 = scmp.ne.s32.totalorder %s3567_s14, %s3155_s15  ;;  %s3160_s18 = scalar_lea.hbm %s4443_s2, 8192 }
  0x7e   : > { %p3161_p3 = scmp.lt.u32.totalorder %s3567_s14, %s4443_s2  ;;  %p3162_p13 = scmp.lt.u32.totalorder %s3160_s18, %s3155_s15 }
  0x7f   : > { %p3158_p4 = pnand %p3156_p0, %p4499_p8  ;;  %p3164_p5 = scmp.lt.u32.totalorder %s3155_s15, %s3567_s14 }
  0x80   : > { %p3163_p2 = por %p3162_p13, %p3161_p3 }
  0x81   : > { %p3159_p10 = pneg %p3158_p4 }
  0x82   : > { %p3165_p9 = por %p3164_p5, %p3163_p2 }
  0x84   : > { %p3166_p11 = pnand %p3165_p9, %p3159_p10 }
  0x86   : > { %3169 = shalt.err (!%p3166_p11)
}
  0x87   : > { %s3170_s23 = scalar_lea.vmem %s3571_s20, 4096  ;;  %s3374_s8 = smov [#allocation10]  }
  0x88   : > { %p3171_p6 = scmp.ne.s32.totalorder %s3571_s20, %s3170_s23  ;;  %s3175_s12 = sshll.u32 %s3374_s8, 4  ;;  %s3176_s12 = int_to_ptr.vmem [resolvable:$false] %s3175_s12 }
  0x89   : > { %s3177_s3 = scalar_lea.vmem %s3176_s12, 8192  ;;  %p3178_p1 = scmp.lt.s32.totalorder %s3571_s20, %s3176_s12 }
  0x8a   : > { %p3173_p7 = pnand %p3171_p6, %p4499_p8  ;;  %p3179_p0 = scmp.lt.s32.totalorder %s3177_s3, %s3170_s23 }
  0x8c   : > { %p3174_p12 = pneg %p3173_p7  ;;  %p3180_p4 = por %p3179_p0, %p3178_p1 }
  0x8e   : > { %p3181_p3 = pnand %p3180_p4, %p3174_p12 }
  0x90   : > { %3184 = shalt.err (!%p3181_p3)
}
  0x91   : > { %p4500_p10 = scmp.ne.s32.totalorder %s4487_s21, 0  ;;  %s4501_s16 = smov 16  }
  0x92   : > { %s4502_s27 = smov 256   ;;  %s2545_s1 = sshll.u32 %s3504_s22, 3 }
  0x93   : > { %2733 = dma.hbm_to_vmem [thread:$0]  (!%p4500_p10), %s3567_s14, 4096, %s3571_s20, %s3529_s25, %s4502_s27, %s4502_s27, %s4501_s16  }
  0x94   : > { %s2546_s15 = sshll.u32 %s3361_s9, 7  ;;  %s406_s19 = scalar_lea.vmem [#allocation13], %s2545_s1 }
  0x95   : > { %s3662_s18 = scalar_lea.hbm %s4445_s4, %s2546_s15  ;;  %s413_s23 = sshll.u32 %s406_s19, 4  ;;  %s414_s23 = int_to_ptr.vmem [resolvable:$true] %s413_s23 }
  0x96   : > { %s3185_s8 = scalar_lea.hbm %s3662_s18, 128  ;;  %s3190_s25 = scalar_lea.hbm %s4445_s4, 256 }
  0x97   : > { %p3186_p13 = scmp.ne.s32.totalorder %s3662_s18, %s3185_s8  ;;  %p3191_p9 = scmp.lt.u32.totalorder %s3662_s18, %s4445_s4 }
  0x98   : > { %p3192_p11 = scmp.lt.u32.totalorder %s3190_s25, %s3185_s8  ;;  %p3194_p7 = scmp.lt.u32.totalorder %s3185_s8, %s3662_s18 }
  0x99   : > { %p3188_p2 = pnand %p3186_p13, %p4499_p8 }
  0x9a   : > { %p3193_p6 = por %p3192_p11, %p3191_p9 }
  0x9b   : > { %p3189_p5 = pneg %p3188_p2 }
  0x9c   : > { %p3195_p12 = por %p3194_p7, %p3193_p6 }
  0x9e   : > { %p3196_p1 = pnand %p3195_p12, %p3189_p5 }
  0xa0   : > { %3199 = shalt.err (!%p3196_p1)
}
  0xa1   : > { %s3200_s3 = scalar_lea.vmem %s414_s23, 128  ;;  %s3375_s16 = smov [#allocation13]  }
  0xa2   : > { %p3201_p0 = scmp.ne.s32.totalorder %s414_s23, %s3200_s3  ;;  %s3205_s27 = sshll.u32 %s3375_s16, 4  ;;  %s3206_s27 = int_to_ptr.vmem [resolvable:$false] %s3205_s27 }
  0xa3   : > { %s3207_s1 = scalar_lea.vmem %s3206_s27, 256  ;;  %p3208_p13 = scmp.lt.s32.totalorder %s414_s23, %s3206_s27 }
  0xa4   : > { %p3203_p4 = pnand %p3201_p0, %p4499_p8  ;;  %p3209_p2 = scmp.lt.s32.totalorder %s3207_s1, %s3200_s3 }
  0xa6   : > { %p3204_p3 = pneg %p3203_p4  ;;  %p3210_p10 = por %p3209_p2, %p3208_p13 }
  0xa8   : > { %p3211_p9 = pnand %p3210_p10, %p3204_p3 }
  0xaa   : > { %3214 = shalt.err (!%p3211_p9)
}
  0xab   : > { %p4503_p11 = scmp.ne.s32.totalorder %s4487_s21, 0  ;;  %p4504_p5 = scmp.ne.s32.totalorder %s4492_s7, 0 }
  0xac   : > { %p4505_p8 = scmp.eq.s32.totalorder (!%p4504_p5), %s3459_s11, 0 }
  0xad   : > { %2739 = dma.hbm_to_vmem [thread:$0]  (!%p4503_p11), %s3662_s18, 128, %s414_s23, %s3588_s29  }
  0xae   : > { %429 = sbr.rel (%p4504_p5) target bundleno = 2400 (0x960), region = 44 }
  0xb5   : > { %3324 = dma.done.wait (%p4505_p8), [#allocation6], 1024   ;;  %p4506_p6 = pmov %p4505_p8 }
  0xb6   : > { %s3689_s24 = sand.u32 1, %s3459_s11   ;;  %s3692_s15 = sand.u32 1, %s3349_s28  }
  0xb7   : > { %3326 = vsyncadd (%p4506_p6), [#allocation6], 4294966272  ;;  %s2549_s21 = sshll.u32 %s3692_s15, 8  ;;  %s441_s29 = scalar_lea.sflag [#allocation9], %s3689_s24 }
  0xb8   : > { %s3696_s13 = scalar_lea.vmem [#allocation8], %s2549_s21  ;;  %p4507_p10 = scmp.ne.s32.totalorder %s4480_s17, 0 }
  0xba   : > { %3328 = dma.done.wait (%p4507_p10), %s441_s29, 8192  }
  0xbb   : > { %3330 = vsyncadd (%p4507_p10), %s441_s29, 4294959104  ;;  %s2551_s7 = sshll.u32 %s3692_s15, 2  ;;  %s3703_s26 = scalar_lea.vmem [#allocation10], %s2549_s21 }
  0xbc   : > { %s459_s11 = scalar_lea.sflag [#allocation12], %s3689_s24  ;;  %s3706_s18 = scalar_lea.vmem [#allocation11], %s2551_s7 }
  0xbd   : > { %3332 = dma.done.wait (%p4507_p10), %s459_s11, 192  }
  0xbe   : > { %3334 = vsyncadd (%p4507_p10), %s459_s11, 4294967104  ;;  %v3376_v0 = vmov 0   ;;  %v2811_v1 = vld [vmem:[%s3696_s13 + $0x4] ss:$16 sps:$4 sm:$0xff]   ;;  %v2813_v2 = vld [vmem:[%s3696_s13 + $0xc] ss:$16 sps:$4 sm:$0xff]  }
  0xbf   : > { %819 = vmatprep.mubr.bf16.mxu0 %v3376_v0  ;;  %892 = vmatprep.mubr.bf16.mxu1 %v3376_v0  ;;  %v2815_v3 = vld [vmem:[%s3696_s13] ss:$16 sps:$4 sm:$0xff]   ;;  %v2816_v4 = vld [vmem:[%s3696_s13 + $0x8] ss:$16 sps:$4 sm:$0xff]   ;;  %v2817_v5 = vld [vmem:[%s3696_s13 + $0x24] ss:$16 sps:$4 sm:$0xff]  }
  0xc0   : > { %787 = vmatprep.subr.bf16.mxu0 %v2811_v1  ;;  %860 = vmatprep.subr.bf16.mxu1 %v2813_v2  ;;  %v2819_v6 = vld [vmem:[%s3696_s13 + $0x2c] ss:$16 sps:$4 sm:$0xff]   ;;  %v2821_v7 = vld [vmem:[%s3696_s13 + $0x20] ss:$16 sps:$4 sm:$0xff]   ;;  %v2822_v8 = vld [vmem:[%s3696_s13 + $0x28] ss:$16 sps:$4 sm:$0xff]  }
  0xc1   : > { %788 = vmatpush1.bf16.msra.mxu0 %v2815_v3  ;;  %861 = vmatpush1.bf16.msra.mxu1 %v2816_v4  ;;  %v2823_v9 = vld [vmem:[%s3696_s13 + $0x44] ss:$16 sps:$4 sm:$0xff]   ;;  %v2825_v10 = vld [vmem:[%s3696_s13 + $0x4c] ss:$16 sps:$4 sm:$0xff]   ;;  %v2827_v11 = vld [vmem:[%s3696_s13 + $0x40] ss:$16 sps:$4 sm:$0xff]  }
  0xc2   : > { %789 = vmatprep.subr.bf16.mxu0 %v2817_v5  ;;  %862 = vmatprep.subr.bf16.mxu1 %v2819_v6  ;;  %v2828_v12 = vld [vmem:[%s3696_s13 + $0x48] ss:$16 sps:$4 sm:$0xff]   ;;  %v2829_v13 = vld [vmem:[%s3696_s13 + $0x64] ss:$16 sps:$4 sm:$0xff]   ;;  %v2831_v14 = vld [vmem:[%s3696_s13 + $0x6c] ss:$16 sps:$4 sm:$0xff]  }
  0xc3   : > { %v2833_v15 = vld [vmem:[%s3696_s13 + $0x60] ss:$16 sps:$4 sm:$0xff]   ;;  %v2834_v16 = vld [vmem:[%s3696_s13 + $0x68] ss:$16 sps:$4 sm:$0xff]   ;;  %v2835_v17 = vld [vmem:[%s3696_s13 + $0x84] ss:$16 sps:$4 sm:$0xff]  }
  0xc4   : > { %v2837_v18 = vld [vmem:[%s3696_s13 + $0x8c] ss:$16 sps:$4 sm:$0xff]   ;;  %v2839_v19 = vld [vmem:[%s3696_s13 + $0x80] ss:$16 sps:$4 sm:$0xff]   ;;  %v2840_v20 = vld [vmem:[%s3696_s13 + $0x88] ss:$16 sps:$4 sm:$0xff]  }
  0xc5   : > { %790 = vmatpush1.bf16.msra.mxu0 %v2821_v7  ;;  %863 = vmatpush1.bf16.msra.mxu1 %v2822_v8  ;;  %v2841_v21 = vld [vmem:[%s3696_s13 + $0xa4] ss:$16 sps:$4 sm:$0xff]   ;;  %v2843_v22 = vld [vmem:[%s3696_s13 + $0xac] ss:$16 sps:$4 sm:$0xff]   ;;  %v2845_v23 = vld [vmem:[%s3696_s13 + $0xa0] ss:$16 sps:$4 sm:$0xff]  }
  0xc6   : > { %791 = vmatprep.subr.bf16.mxu0 %v2823_v9  ;;  %864 = vmatprep.subr.bf16.mxu1 %v2825_v10  ;;  %v2846_v24 = vld [vmem:[%s3696_s13 + $0xa8] ss:$16 sps:$4 sm:$0xff]   ;;  %v2847_v25 = vld [vmem:[%s3696_s13 + $0xc4] ss:$16 sps:$4 sm:$0xff]   ;;  %v2849_v26 = vld [vmem:[%s3696_s13 + $0xcc] ss:$16 sps:$4 sm:$0xff]  }
  0xc7   : > { %v2851_v27 = vld [vmem:[%s3696_s13 + $0xc0] ss:$16 sps:$4 sm:$0xff]   ;;  %v2852_v28 = vld [vmem:[%s3696_s13 + $0xc8] ss:$16 sps:$4 sm:$0xff]   ;;  %v2853_v29 = vld [vmem:[%s3696_s13 + $0xe4] ss:$16 sps:$4 sm:$0xff]  }
  0xc8   : > { %v2855_v30 = vld [vmem:[%s3696_s13 + $0xec] ss:$16 sps:$4 sm:$0xff]   ;;  %v2857_v31 = vld [vmem:[%s3696_s13 + $0xe0] ss:$16 sps:$4 sm:$0xff]   ;;  %v2858_v32 = vld [vmem:[%s3696_s13 + $0xe8] ss:$16 sps:$4 sm:$0xff]  }
  0xc9   : > { %792 = vmatpush1.bf16.msra.mxu0 %v2827_v11  ;;  %865 = vmatpush1.bf16.msra.mxu1 %v2828_v12  ;;  %v561_v33 = vld [vmem:[#allocation5] sm:$0xff]  ;;  %v562_v34 = vld [vmem:[#allocation5 + $0x8] sm:$0xff]  ;;  %v563_v42 = vld [vmem:[#allocation5 + $0x10] sm:$0xff]  ;;  %s3853_s17 = sshll.u32 %s3692_s15, 3  ;;  %s2704_s23 = smul.u32 224, %s3357_s30 }
  0xca   : > { %793 = vmatprep.subr.bf16.mxu0 %v2829_v13  ;;  %866 = vmatprep.subr.bf16.mxu1 %v2831_v14  ;;  %v3747_v35 = vld [vmem:[%s3703_s26 + $0x4] ss:$16 sps:$4 sm:$0xff]   ;;  %v3750_v36 = vld [vmem:[%s3703_s26 + $0xc] ss:$16 sps:$4 sm:$0xff]   ;;  %v569_v37 = vpack.c.bf16 %v562_v34, %v561_v33  ;;  %v3753_v38 = vld [vmem:[%s3703_s26] ss:$16 sps:$4 sm:$0xff]  }
  0xcb   : > { %v3756_v39 = vld [vmem:[%s3703_s26 + $0x8] ss:$16 sps:$4 sm:$0xff]   ;;  %v3761_v40 = vld [vmem:[%s3703_s26 + $0x24] ss:$16 sps:$4 sm:$0xff]   ;;  %v3764_v41 = vld [vmem:[%s3703_s26 + $0x20] ss:$16 sps:$4 sm:$0xff]  }
  0xcc   : > { %v3767_v43 = vld [vmem:[%s3703_s26 + $0x2c] ss:$16 sps:$4 sm:$0xff]   ;;  %v3772_v45 = vld [vmem:[%s3703_s26 + $0x28] ss:$16 sps:$4 sm:$0xff]   ;;  %v3777_v46 = vld [vmem:[%s3703_s26 + $0x44] ss:$16 sps:$4 sm:$0xff]  }
  0xcd   : > { %794 = vmatpush1.bf16.msra.mxu0 %v2833_v15  ;;  %867 = vmatpush1.bf16.msra.mxu1 %v2834_v16  ;;  %v564_v44 = vld [vmem:[#allocation5 + $0x18] sm:$0xff]  ;;  %v3787_v49 = vld [vmem:[%s3703_s26 + $0x40] ss:$16 sps:$4 sm:$0xff]   ;;  %v3795_v51 = vld [vmem:[%s3703_s26 + $0x64] ss:$16 sps:$4 sm:$0xff]   ;;  %s471_s19 = scalar_lea.vmem [#allocation13], %s3853_s17  ;;  %v607_v16 = vlaneseq }
  0xce   : > { %795 = vmatprep.subr.bf16.mxu0 %v2835_v17  ;;  %868 = vmatprep.subr.bf16.mxu1 %v2837_v18  ;;  %v3780_v47 = vld [vmem:[%s3703_s26 + $0x4c] ss:$16 sps:$4 sm:$0xff]   ;;  %v570_v48 = vpack.c.bf16 %v564_v44, %v563_v42  ;;  %v3790_v50 = vld [vmem:[%s3703_s26 + $0x48] ss:$16 sps:$4 sm:$0xff]   ;;  %v3801_v53 = vld [vmem:[%s3703_s26 + $0x60] ss:$16 sps:$4 sm:$0xff]  }
  0xcf   : > { %v3798_v52 = vld [vmem:[%s3703_s26 + $0x6c] ss:$16 sps:$4 sm:$0xff]   ;;  %v565_v54 = vld [vmem:[#allocation5 + $0x20] sm:$0xff]  ;;  %v3806_v56 = vld [vmem:[%s3703_s26 + $0x68] ss:$16 sps:$4 sm:$0xff]   ;;  %v608_v17 = vshrl.u32 %v607_v16, 7 }
  0xd0   : > { %v566_v55 = vld [vmem:[#allocation5 + $0x28] sm:$0xff]  ;;  %v3811_v57 = vld [vmem:[%s3703_s26 + $0x84] ss:$16 sps:$4 sm:$0xff]   ;;  %v3821_v60 = vld [vmem:[%s3703_s26 + $0x80] ss:$16 sps:$4 sm:$0xff]   ;;  %s1002_s8 = scalar_lea.vmem [#allocation2], %s2704_s23 }
  0xd1   : > { %796 = vmatpush1.bf16.msra.mxu0 %v2839_v19  ;;  %869 = vmatpush1.bf16.msra.mxu1 %v2840_v20  ;;  %v3814_v58 = vld [vmem:[%s3703_s26 + $0x8c] ss:$16 sps:$4 sm:$0xff]   ;;  %v571_v59 = vpack.c.bf16 %v566_v55, %v565_v54  ;;  %v3824_v61 = vld [vmem:[%s3703_s26 + $0x88] ss:$16 sps:$4 sm:$0xff]   ;;  %v3829_v62 = vld [vmem:[%s3703_s26 + $0xa4] ss:$16 sps:$4 sm:$0xff]  }
  0xd2   : > { %797 = vmatprep.subr.bf16.mxu0 %v2841_v21  ;;  %870 = vmatprep.subr.bf16.mxu1 %v2843_v22  ;;  %v3832_v63 = vld [vmem:[%s3703_s26 + $0xac] ss:$16 sps:$4 sm:$0xff]   ;;  %v3835_v1 = vld [vmem:[%s3703_s26 + $0xa0] ss:$16 sps:$4 sm:$0xff]   ;;  %v3840_v4 = vld [vmem:[%s3703_s26 + $0xa8] ss:$16 sps:$4 sm:$0xff]  }
  0xd3   : > { %v567_v2 = vld [vmem:[#allocation5 + $0x30] sm:$0xff]  ;;  %v568_v3 = vld [vmem:[#allocation5 + $0x38] sm:$0xff]  ;;  %v609_v18 = vsub.s32 0, %v608_v17  ;;  %v617_v19 = vsub.s32 2, %v608_v17  ;;  %v605_v20 = vld [vmem:[%s3706_s18] sm:$0xf] }
  0xd4   : > { %v3845_v5 = vld [vmem:[%s3703_s26 + $0xc4] ss:$16 sps:$4 sm:$0xff]   ;;  %v3848_v6 = vld [vmem:[%s3703_s26 + $0xcc] ss:$16 sps:$4 sm:$0xff]   ;;  %v572_v7 = vpack.c.bf16 %v568_v3, %v567_v2  ;;  %v3858_v8 = vld [vmem:[%s3703_s26 + $0xc0] ss:$16 sps:$4 sm:$0xff]  }
  0xd5   : > { %798 = vmatpush1.bf16.msra.mxu0 %v2845_v23  ;;  %871 = vmatpush1.bf16.msra.mxu1 %v2846_v24  ;;  %v3861_v9 = vld [vmem:[%s3703_s26 + $0xc8] ss:$16 sps:$4 sm:$0xff]   ;;  %v3866_v10 = vld [vmem:[%s3703_s26 + $0xe4] ss:$16 sps:$4 sm:$0xff]   ;;  %v3869_v11 = vld [vmem:[%s3703_s26 + $0xec] ss:$16 sps:$4 sm:$0xff]   ;;  %v3923_v23 = vrot.slane %v605_v20, %v609_v18  ;;  %v3925_v24 = vrot.slane %v605_v20, %v617_v19 }
  0xd6   : > { %799 = vmatprep.subr.bf16.mxu0 %v2847_v25  ;;  %872 = vmatprep.subr.bf16.mxu1 %v2849_v26  ;;  %v3874_v12 = vld [vmem:[%s3703_s26 + $0xe0] ss:$16 sps:$4 sm:$0xff]   ;;  %v3878_v14 = vld [vmem:[%s3703_s26 + $0xe8] ss:$16 sps:$4 sm:$0xff]   ;;  %v613_v21 = vsub.s32 1, %v608_v17  ;;  %v621_v22 = vsub.s32 3, %v608_v17 }
  0xd7   : > { %v557_v13 = vld [vmem:[%s471_s19] sm:$0xff]  ;;  %p543_p7 = scmp.lt.s32.totalorder %s3357_s30, 1  ;;  %s2553_s3 = sshll.u32 %s3692_s15, 6 }
  0xd8   : > { %v1007_v15 = vpack.c.bf16 %v557_v13, %v557_v13  ;;  %v3927_v25 = vrot.slane %v605_v20, %v613_v21  ;;  %v3929_v26 = vrot.slane %v605_v20, %v621_v22  ;;  %s2626_s16 = smul.u32 56, %s3357_s30  ;;  %s3974_s27 = scalar_lea.vmem [#allocation14], %s2553_s3 }
  0xd9   : > { %800 = vmatpush1.bf16.msra.mxu0 %v2851_v27  ;;  %873 = vmatpush1.bf16.msra.mxu1 %v2852_v28  ;;  %s544_s20 = scalar_select %p543_p7, %s3357_s30, 1 }
  0xda   : > { %801 = vmatprep.subr.bf16.mxu0 %v2853_v29  ;;  %874 = vmatprep.subr.bf16.mxu1 %v2855_v30  ;;  %s1281_s1 = scalar_lea.vmem %s3974_s27, %s2626_s16 [#allocation14]  ;;  %s2627_s21 = smul.u32 160, %s3357_s30 }
  0xdb   : > { %s2556_s22 = sshll.u32 %s544_s20, 3  ;;  %s2635_s13 = smul.u32 40, %s3357_s30 }
  0xdc   : > { %s546_s12 = scalar_lea.vmem %s4446_s5, %s2556_s22  ;;  %s2364_s29 = scalar_lea.vmem [#allocation2], %s2627_s21 }
  0xdd   : > { %802 = vmatpush1.bf16.msra.mxu0 %v2857_v31  ;;  %875 = vmatpush1.bf16.msra.mxu1 %v2858_v32  ;;  %s2368_s7 = scalar_lea.vmem %s3974_s27, %s2635_s13 [#allocation14]  ;;  %s2637_s11 = smul.u32 96, %s3357_s30 }
  0xde   : > { %1168 = vmatprep.subr.bf16.mxu0 %v3747_v35  ;;  %1209 = vmatprep.subr.bf16.mxu1 %v3750_v36  ;;  %s2645_s19 = smul.u32 24, %s3357_s30  ;;  %s2655_s22 = sshll.u32 %s3357_s30, 3 }
  0xdf   : > { %s2372_s18 = scalar_lea.vmem [#allocation2], %s2637_s11  ;;  %s2382_s25 = scalar_lea.vmem %s3974_s27, %s2655_s22 [#allocation14] }
  0xe0   : > { %820 = vmatmul.mubr.bf16.vlgmr.msra.gmra.mrb[0].mxu0 %v569_v37  ;;  %893 = vmatmul.mubr.bf16.vlgmr.msra.gmra.mrb[0].mxu1 %v569_v37  ;;  %s2376_s23 = scalar_lea.vmem %s3974_s27, %s2645_s19 [#allocation14]  ;;  %s1663_s14 = ssub.s32 4, %s3357_s30 }
  0xe1   : > { %1169 = vmatpush1.bf16.msra.mxu0 %v3753_v38  ;;  %1210 = vmatpush1.bf16.msra.mxu1 %v3756_v39  ;;  %s2662_s16 = sshll.u32 %s1663_s14, 3  ;;  %s2663_s21 = smul.u32 4294967200, %s3357_s30 }
  0xe2   : > { %1170 = vmatprep.subr.bf16.mxu0 %v3761_v40  ;;  %829 = vmatprep.mubr.bf16.mxu0 %v3376_v0  ;;  %s2691_s22 = smul.u32 4294967240, %s3357_s30 }
  0xe3   : > { %902 = vmatprep.mubr.bf16.mxu1 %v3376_v0  ;;  %1211 = vmatprep.subr.bf16.mxu1 %v3767_v43 }
  0xe5   : > { %1171 = vmatpush1.bf16.msra.mxu0 %v3764_v41  ;;  %1212 = vmatpush1.bf16.msra.mxu1 %v3772_v45 }
  0xe6   : > { %1172 = vmatprep.subr.bf16.mxu0 %v3777_v46  ;;  %1213 = vmatprep.subr.bf16.mxu1 %v3780_v47 }
  0xe8   : > { %830 = vmatmul.mubr.bf16.gmra.mrb[4].mxu0 %v570_v48  ;;  %903 = vmatmul.mubr.bf16.gmra.mrb[4].mxu1 %v570_v48 }
  0xe9   : > { %1173 = vmatpush1.bf16.msra.mxu0 %v3787_v49  ;;  %1214 = vmatpush1.bf16.msra.mxu1 %v3790_v50 }
  0xea   : > { %1174 = vmatprep.subr.bf16.mxu0 %v3795_v51  ;;  %839 = vmatprep.mubr.bf16.mxu0 %v3376_v0 }
  0xeb   : > { %912 = vmatprep.mubr.bf16.mxu1 %v3376_v0  ;;  %1215 = vmatprep.subr.bf16.mxu1 %v3798_v52 }
  0xed   : > { %1175 = vmatpush1.bf16.msra.mxu0 %v3801_v53  ;;  %1216 = vmatpush1.bf16.msra.mxu1 %v3806_v56 }
  0xee   : > { %1176 = vmatprep.subr.bf16.mxu0 %v3811_v57  ;;  %1217 = vmatprep.subr.bf16.mxu1 %v3814_v58 }
  0xf0   : > { %840 = vmatmul.mubr.bf16.gmra.mrb[8].mxu0 %v571_v59  ;;  %913 = vmatmul.mubr.bf16.gmra.mrb[8].mxu1 %v571_v59 }
  0xf1   : > { %1177 = vmatpush1.bf16.msra.mxu0 %v3821_v60  ;;  %1218 = vmatpush1.bf16.msra.mxu1 %v3824_v61 }
  0xf2   : > { %1178 = vmatprep.subr.bf16.mxu0 %v3829_v62  ;;  %849 = vmatprep.mubr.bf16.mxu0 %v3376_v0 }
  0xf3   : > { %922 = vmatprep.mubr.bf16.mxu1 %v3376_v0  ;;  %1219 = vmatprep.subr.bf16.mxu1 %v3832_v63 }
  0xf5   : > { %1179 = vmatpush1.bf16.msra.mxu0 %v3835_v1  ;;  %1220 = vmatpush1.bf16.msra.mxu1 %v3840_v4 }
  0xf6   : > { %1180 = vmatprep.subr.bf16.mxu0 %v3845_v5  ;;  %1221 = vmatprep.subr.bf16.mxu1 %v3848_v6 }
  0xf8   : > { %850 = vmatmul.mubr.bf16.gmra.mrb[12].mxu0 %v572_v7  ;;  %923 = vmatmul.mubr.bf16.gmra.mrb[12].mxu1 %v572_v7 }
  0xf9   : > { %1181 = vmatpush1.bf16.msra.mxu0 %v3858_v8  ;;  %1222 = vmatpush1.bf16.msra.mxu1 %v3861_v9 }
  0xfa   : > { %1182 = vmatprep.subr.bf16.mxu0 %v3866_v10  ;;  %1200 = vmatprep.mubr.bf16.mxu0 %v3376_v0 }
  0xfb   : > { %1223 = vmatprep.subr.bf16.mxu1 %v3869_v11  ;;  %1241 = vmatprep.mubr.bf16.mxu1 %v3376_v0 }
  0xfd   : > { %1183 = vmatpush1.bf16.msra.mxu0 %v3874_v12  ;;  %1224 = vmatpush1.bf16.msra.mxu1 %v3878_v14 }
  0xfe   : > { %1295 = vmatprep.subr.bf16.mxu0 %v3747_v35  ;;  %1336 = vmatprep.subr.bf16.mxu1 %v3750_v36 }
 0x100   : > { %1201 = vmatmul.mubr.bf16.vlgmr.msra.gmra.mrb[16].mxu0 %v1007_v15  ;;  %1242 = vmatmul.mubr.bf16.vlgmr.msra.gmra.mrb[16].mxu1 %v1007_v15 }
 0x101   : > { %1296 = vmatpush1.bf16.msra.mxu0 %v3753_v38  ;;  %1337 = vmatpush1.bf16.msra.mxu1 %v3756_v39 }
 0x102   : > { %1297 = vmatprep.subr.bf16.mxu0 %v3761_v40  ;;  %1338 = vmatprep.subr.bf16.mxu1 %v3767_v43 }
 0x103   : > { %1327 = vmatprep.mubr.bf16.mxu0 %v3376_v0  ;;  %1368 = vmatprep.mubr.bf16.mxu1 %v3376_v0 }
 0x105   : > { %1298 = vmatpush1.bf16.msra.mxu0 %v3764_v41  ;;  %1339 = vmatpush1.bf16.msra.mxu1 %v3772_v45 }
 0x106   : > { %1299 = vmatprep.subr.bf16.mxu0 %v3777_v46  ;;  %1340 = vmatprep.subr.bf16.mxu1 %v3780_v47 }
 0x109   : > { %1300 = vmatpush1.bf16.msra.mxu0 %v3787_v49  ;;  %1341 = vmatpush1.bf16.msra.mxu1 %v3790_v50 }
 0x10a   : > { %1301 = vmatprep.subr.bf16.mxu0 %v3795_v51  ;;  %1342 = vmatprep.subr.bf16.mxu1 %v3798_v52 }
 0x10d   : > { %1302 = vmatpush1.bf16.msra.mxu0 %v3801_v53  ;;  %1343 = vmatpush1.bf16.msra.mxu1 %v3806_v56 }
 0x10e   : > { %1303 = vmatprep.subr.bf16.mxu0 %v3811_v57  ;;  %1344 = vmatprep.subr.bf16.mxu1 %v3814_v58 }
 0x111   : > { %1304 = vmatpush1.bf16.msra.mxu0 %v3821_v60  ;;  %1345 = vmatpush1.bf16.msra.mxu1 %v3824_v61 }
 0x112   : > { %1305 = vmatprep.subr.bf16.mxu0 %v3829_v62  ;;  %1346 = vmatprep.subr.bf16.mxu1 %v3832_v63 }
 0x115   : > { %1306 = vmatpush1.bf16.msra.mxu0 %v3835_v1  ;;  %1347 = vmatpush1.bf16.msra.mxu1 %v3840_v4 }
 0x116   : > { %1307 = vmatprep.subr.bf16.mxu0 %v3845_v5  ;;  %1348 = vmatprep.subr.bf16.mxu1 %v3848_v6 }
 0x119   : > { %1308 = vmatpush1.bf16.msra.mxu0 %v3858_v8  ;;  %1349 = vmatpush1.bf16.msra.mxu1 %v3861_v9 }
 0x11a   : > { %1309 = vmatprep.subr.bf16.mxu0 %v3866_v10  ;;  %1350 = vmatprep.subr.bf16.mxu1 %v3869_v11 }
 0x11d   : > { %1310 = vmatpush1.bf16.msra.mxu0 %v3874_v12  ;;  %1351 = vmatpush1.bf16.msra.mxu1 %v3878_v14 }
 0x11e   : > { %1422 = vmatprep.subr.bf16.mxu0 %v3747_v35  ;;  %1463 = vmatprep.subr.bf16.mxu1 %v3750_v36 }
 0x1b3   : > { %v821_v27 = vpop.f32.mrb[0].mxu0  ;;  %v894_v28 = vpop.f32.mrb[0].mxu1 }
 0x1b4   : > { %v822_v29 = vadd.f32 %v821_v27, %v3923_v23  ;;  %v895_v30 = vadd.f32 %v894_v28, %v3925_v24  ;;  %v823_v31 = vpop.f32.mrb[1].mxu0  ;;  %v896_v32 = vpop.f32.mrb[1].mxu1 }
 0x1b5   : > { %v824_v33 = vadd.f32 %v823_v31, %v3927_v25  ;;  %v897_v34 = vadd.f32 %v896_v32, %v3929_v26  ;;  %v825_v37 = vpop.f32.mrb[2].mxu0  ;;  %v898_v42 = vpop.f32.mrb[2].mxu1 }
 0x1b6   : > { %933 = vst [vmem:[#allocation2] sm:$0xff] %v822_v29  ;;  %935 = vst [vmem:[#allocation2 + $0x10] sm:$0xff] %v895_v30  ;;  %v826_v44 = vadd.f32 %v825_v37, %v3923_v23  ;;  %v899_v48 = vadd.f32 %v898_v42, %v3925_v24  ;;  %v827_v54 = vpop.f32.mrb[3].mxu0  ;;  %v900_v55 = vpop.f32.mrb[3].mxu1 }
 0x1b7   : > { %934 = vst [vmem:[#allocation2 + $0x8] sm:$0xff] %v824_v33  ;;  %936 = vst [vmem:[#allocation2 + $0x18] sm:$0xff] %v897_v34  ;;  %v828_v59 = vadd.f32 %v827_v54, %v3927_v25  ;;  %v901_v2 = vadd.f32 %v900_v55, %v3929_v26 }
 0x1b8   : > { %937 = vst [vmem:[#allocation2 + $0x20] sm:$0xff] %v826_v44  ;;  %939 = vst [vmem:[#allocation2 + $0x30] sm:$0xff] %v899_v48 }
 0x1b9   : > { %938 = vst [vmem:[#allocation2 + $0x28] sm:$0xff] %v828_v59  ;;  %940 = vst [vmem:[#allocation2 + $0x38] sm:$0xff] %v901_v2 }
 0x1bb   : > { %v831_v3 = vpop.f32.mrb[4].mxu0  ;;  %v904_v7 = vpop.f32.mrb[4].mxu1 }
 0x1bc   : > { %v832_v13 = vadd.f32 %v831_v3, %v3923_v23  ;;  %v905_v15 = vadd.f32 %v904_v7, %v3925_v24  ;;  %v833_v16 = vpop.f32.mrb[5].mxu0  ;;  %v906_v17 = vpop.f32.mrb[5].mxu1 }
 0x1bd   : > { %v834_v18 = vadd.f32 %v833_v16, %v3927_v25  ;;  %v907_v19 = vadd.f32 %v906_v17, %v3929_v26  ;;  %v835_v20 = vpop.f32.mrb[6].mxu0  ;;  %v908_v21 = vpop.f32.mrb[6].mxu1 }
 0x1be   : > { %941 = vst [vmem:[#allocation2 + $0x40] sm:$0xff] %v832_v13  ;;  %943 = vst [vmem:[#allocation2 + $0x50] sm:$0xff] %v905_v15  ;;  %v836_v22 = vadd.f32 %v835_v20, %v3923_v23  ;;  %v909_v27 = vadd.f32 %v908_v21, %v3925_v24  ;;  %v837_v28 = vpop.f32.mrb[7].mxu0  ;;  %v910_v29 = vpop.f32.mrb[7].mxu1 }
 0x1bf   : > { %942 = vst [vmem:[#allocation2 + $0x48] sm:$0xff] %v834_v18  ;;  %944 = vst [vmem:[#allocation2 + $0x58] sm:$0xff] %v907_v19  ;;  %v838_v30 = vadd.f32 %v837_v28, %v3927_v25  ;;  %v911_v31 = vadd.f32 %v910_v29, %v3929_v26 }
 0x1c0   : > { %945 = vst [vmem:[#allocation2 + $0x60] sm:$0xff] %v836_v22  ;;  %947 = vst [vmem:[#allocation2 + $0x70] sm:$0xff] %v909_v27 }
 0x1c1   : > { %946 = vst [vmem:[#allocation2 + $0x68] sm:$0xff] %v838_v30  ;;  %948 = vst [vmem:[#allocation2 + $0x78] sm:$0xff] %v911_v31 }
 0x1c3   : > { %v841_v32 = vpop.f32.mrb[8].mxu0  ;;  %v914_v33 = vpop.f32.mrb[8].mxu1 }
 0x1c4   : > { %v842_v34 = vadd.f32 %v841_v32, %v3923_v23  ;;  %v915_v37 = vadd.f32 %v914_v33, %v3925_v24  ;;  %v843_v42 = vpop.f32.mrb[9].mxu0  ;;  %v916_v44 = vpop.f32.mrb[9].mxu1 }
 0x1c5   : > { %v844_v48 = vadd.f32 %v843_v42, %v3927_v25  ;;  %v917_v54 = vadd.f32 %v916_v44, %v3929_v26  ;;  %v845_v55 = vpop.f32.mrb[10].mxu0  ;;  %v918_v59 = vpop.f32.mrb[10].mxu1 }
 0x1c6   : > { %949 = vst [vmem:[#allocation2 + $0x80] sm:$0xff] %v842_v34  ;;  %951 = vst [vmem:[#allocation2 + $0x90] sm:$0xff] %v915_v37  ;;  %v846_v2 = vadd.f32 %v845_v55, %v3923_v23  ;;  %v919_v3 = vadd.f32 %v918_v59, %v3925_v24  ;;  %v847_v7 = vpop.f32.mrb[11].mxu0  ;;  %v920_v13 = vpop.f32.mrb[11].mxu1 }
 0x1c7   : > { %950 = vst [vmem:[#allocation2 + $0x88] sm:$0xff] %v844_v48  ;;  %952 = vst [vmem:[#allocation2 + $0x98] sm:$0xff] %v917_v54  ;;  %v848_v15 = vadd.f32 %v847_v7, %v3927_v25  ;;  %v921_v16 = vadd.f32 %v920_v13, %v3929_v26 }
 0x1c8   : > { %953 = vst [vmem:[#allocation2 + $0xa0] sm:$0xff] %v846_v2  ;;  %955 = vst [vmem:[#allocation2 + $0xb0] sm:$0xff] %v919_v3 }
 0x1c9   : > { %954 = vst [vmem:[#allocation2 + $0xa8] sm:$0xff] %v848_v15  ;;  %956 = vst [vmem:[#allocation2 + $0xb8] sm:$0xff] %v921_v16 }
 0x1cb   : > { %v851_v17 = vpop.f32.mrb[12].mxu0  ;;  %v924_v18 = vpop.f32.mrb[12].mxu1 }
 0x1cc   : > { %v852_v19 = vadd.f32 %v851_v17, %v3923_v23  ;;  %v925_v20 = vadd.f32 %v924_v18, %v3925_v24  ;;  %v853_v21 = vpop.f32.mrb[13].mxu0  ;;  %v926_v22 = vpop.f32.mrb[13].mxu1 }
 0x1cd   : > { %v854_v27 = vadd.f32 %v853_v21, %v3927_v25  ;;  %v927_v28 = vadd.f32 %v926_v22, %v3929_v26  ;;  %v855_v29 = vpop.f32.mrb[14].mxu0  ;;  %v928_v30 = vpop.f32.mrb[14].mxu1 }
 0x1ce   : > { %957 = vst [vmem:[#allocation2 + $0xc0] sm:$0xff] %v852_v19  ;;  %959 = vst [vmem:[#allocation2 + $0xd0] sm:$0xff] %v925_v20  ;;  %v856_v31 = vadd.f32 %v855_v29, %v3923_v23  ;;  %v929_v32 = vadd.f32 %v928_v30, %v3925_v24  ;;  %v857_v33 = vpop.f32.mrb[15].mxu0  ;;  %v930_v34 = vpop.f32.mrb[15].mxu1 }
 0x1cf   : > { %958 = vst [vmem:[#allocation2 + $0xc8] sm:$0xff] %v854_v27  ;;  %960 = vst [vmem:[#allocation2 + $0xd8] sm:$0xff] %v927_v28  ;;  %v858_v37 = vadd.f32 %v857_v33, %v3927_v25  ;;  %v931_v42 = vadd.f32 %v930_v34, %v3929_v26 }
 0x1d0   : > { %961 = vst [vmem:[#allocation2 + $0xe0] sm:$0xff] %v856_v31  ;;  %963 = vst [vmem:[#allocation2 + $0xf0] sm:$0xff] %v929_v32  ;;  %v559_v31 = vld [vmem:[%s546_s12] sm:$0xff]  ;;  %s2705_s12 = sshll.u32 %s1663_s14, 5  ;;  %s2410_s14 = scalar_lea.vmem %s3974_s27, %s2691_s22 [#allocation14] }
 0x1d1   : > { %962 = vst [vmem:[#allocation2 + $0xe8] sm:$0xff] %v858_v37  ;;  %964 = vst [vmem:[#allocation2 + $0xf8] sm:$0xff] %v931_v42  ;;  %s1668_s3 = scalar_lea.vmem [#allocation2], %s2705_s12  ;;  %s530_s12 = scalar_lea.vmem [#allocation15], %s3853_s17 }
 0x1d3   : > { %v1202_v44 = vpop.f32.mrb[16].mxu0  ;;  %v1243_v48 = vpop.f32.mrb[16].mxu1 }
 0x1d4   : > { %v1204_v54 = vpop.f32.mrb[17].mxu0  ;;  %v1245_v55 = vpop.f32.mrb[17].mxu1 }
 0x1d5   : > { %v1206_v23 = vpop.f32.mrb[18].mxu0  ;;  %v1247_v59 = vpop.f32.mrb[18].mxu1 }
 0x1d6   : > { %v1207_v24 = vpop.f32.mrb[19].mxu0  ;;  %v1248_v2 = vpop.f32.mrb[19].mxu1 }
 0x1d8   : > { %v1003_v3 = vld [vmem:[%s1002_s8] sm:$0xff]  ;;  %v1004_v7 = vld [vmem:[%s1002_s8 + $0x8] sm:$0xff]  ;;  %v1006_v16 = vld [vmem:[%s1002_s8 + $0x18] sm:$0xff] }
 0x1d9   : > { %v1250_v25 = vadd.f32 %v1202_v44, %v1003_v3  ;;  %v1251_v26 = vadd.f32 %v1204_v54, %v1004_v7  ;;  %v1253_v17 = vadd.f32 %v1245_v55, %v1006_v16  ;;  %v1005_v18 = vld [vmem:[%s1002_s8 + $0x10] sm:$0xff]  ;;  %v2628_v59 = vld [vmem:[%s2364_s29 + $0x20] sm:$0xff]  ;;  %v2629_v7 = vld [vmem:[%s2364_s29 + $0x28] sm:$0xff]  ;;  %s2647_s8 = sshll.u32 %s3357_s30, 5 }
 0x1da   : > { %v1252_v20 = vadd.f32 %v1243_v48, %v1005_v18  ;;  %s2379_s20 = scalar_lea.vmem [#allocation2], %s2647_s8 }
 0x1db   : > { %v2623_v13 = vmul.f32 -1.442695, %v1250_v25  ;;  %v2624_v15 = vmul.f32 -1.442695, %v1251_v26  ;;  %v2625_v19 = vmul.f32 -1.442695, %v1253_v17 }
 0x1dd   : > { %2907 = vpow2.f32 %v2623_v13 }
 0x1de   : > { %2909 = vpow2.f32 %v2624_v15 }
 0x1df   : > { %2911 = vpow2.f32 %v2625_v19 }
 0x1e0   : > { %2913 = vtanh.f32 %v1252_v20 }
 0x1e7   : > { %v2908_v21 = vpop.eup %2907 }
 0x1e8   : > { %v2910_v22 = vpop.eup %2909  ;;  %v1257_v27 = vadd.f32 1.0, %v2908_v21  ;;  %v2631_v21 = vld [vmem:[%s2364_s29 + $0x38] sm:$0xff] }
 0x1e9   : > { %v1263_v28 = vadd.f32 1.0, %v2910_v22  ;;  %v2912_v29 = vpop.eup %2911 }
 0x1ea   : > { %2915 = vrcp.f32 %v1257_v27  ;;  %v2914_v30 = vpop.eup %2913  ;;  %v1270_v37 = vadd.f32 1.0, %v2912_v29  ;;  %v2630_v27 = vld [vmem:[%s2364_s29 + $0x30] sm:$0xff]  ;;  %s2390_s29 = scalar_lea.vmem [#allocation2], %s2663_s21 }
 0x1eb   : > { %2917 = vrcp.f32 %v1263_v28 }
 0x1ec   : > { %2919 = vrcp.f32 %v1270_v37 }
 0x1f4   : > { %v2916_v32 = vpop.eup %2915 }
 0x1f5   : > { %v2918_v33 = vpop.eup %2917  ;;  %v1274_v34 = vmul.f32 %v2916_v32, %v2914_v30 }
 0x1f6   : > { %v1273_v42 = vmul.f32 %v2918_v33, %v559_v31  ;;  %v2920_v48 = vpop.eup %2919 }
 0x1f8   : > { %v3969_v44 = vadd.f32 %v1274_v34, %v1273_v42 }
 0x1fa   : > { %2921 = vtanh.f32 %v3969_v44 }
 0x204   : > { %v2922_v54 = vpop.eup %2921 }
 0x205   : > { %v1277_v55 = vmul.f32 %v2922_v54, %v2920_v48 }
 0x207   : > { %1282 = vst [vmem:[%s1281_s1] sm:$0xff] %v1277_v55  ;;  %v1294_v23 = vpack.c.bf16 %v1277_v55, %v1277_v55  ;;  %s1787_s1 = scalar_lea.vmem %s3974_s27, %s2662_s16 [#allocation14] }
 0x209   : > { %1328 = vmatmul.mubr.bf16.vlgmr.msra.gmra.mrb[20].mxu0 %v1294_v23  ;;  %1369 = vmatmul.mubr.bf16.vlgmr.msra.gmra.mrb[20].mxu1 %v1294_v23 }
 0x20a   : > { %1423 = vmatpush1.bf16.msra.mxu0 %v3753_v38  ;;  %1464 = vmatpush1.bf16.msra.mxu1 %v3756_v39 }
 0x20b   : > { %1424 = vmatprep.subr.bf16.mxu0 %v3761_v40  ;;  %1465 = vmatprep.subr.bf16.mxu1 %v3767_v43 }
 0x20c   : > { %1454 = vmatprep.mubr.bf16.mxu0 %v3376_v0  ;;  %1495 = vmatprep.mubr.bf16.mxu1 %v3376_v0 }
 0x20e   : > { %1425 = vmatpush1.bf16.msra.mxu0 %v3764_v41  ;;  %1466 = vmatpush1.bf16.msra.mxu1 %v3772_v45 }
 0x20f   : > { %1426 = vmatprep.subr.bf16.mxu0 %v3777_v46  ;;  %1467 = vmatprep.subr.bf16.mxu1 %v3780_v47 }
 0x212   : > { %1427 = vmatpush1.bf16.msra.mxu0 %v3787_v49  ;;  %1468 = vmatpush1.bf16.msra.mxu1 %v3790_v50 }
 0x213   : > { %1428 = vmatprep.subr.bf16.mxu0 %v3795_v51  ;;  %1469 = vmatprep.subr.bf16.mxu1 %v3798_v52 }
 0x216   : > { %1429 = vmatpush1.bf16.msra.mxu0 %v3801_v53  ;;  %1470 = vmatpush1.bf16.msra.mxu1 %v3806_v56 }
 0x217   : > { %1430 = vmatprep.subr.bf16.mxu0 %v3811_v57  ;;  %1471 = vmatprep.subr.bf16.mxu1 %v3814_v58 }
 0x21a   : > { %1431 = vmatpush1.bf16.msra.mxu0 %v3821_v60  ;;  %1472 = vmatpush1.bf16.msra.mxu1 %v3824_v61 }
 0x21b   : > { %1432 = vmatprep.subr.bf16.mxu0 %v3829_v62  ;;  %1473 = vmatprep.subr.bf16.mxu1 %v3832_v63 }
 0x21e   : > { %1433 = vmatpush1.bf16.msra.mxu0 %v3835_v1  ;;  %1474 = vmatpush1.bf16.msra.mxu1 %v3840_v4 }
 0x21f   : > { %1434 = vmatprep.subr.bf16.mxu0 %v3845_v5  ;;  %1475 = vmatprep.subr.bf16.mxu1 %v3848_v6 }
 0x222   : > { %1435 = vmatpush1.bf16.msra.mxu0 %v3858_v8  ;;  %1476 = vmatpush1.bf16.msra.mxu1 %v3861_v9 }
 0x223   : > { %1436 = vmatprep.subr.bf16.mxu0 %v3866_v10  ;;  %1477 = vmatprep.subr.bf16.mxu1 %v3869_v11 }
 0x226   : > { %1437 = vmatpush1.bf16.msra.mxu0 %v3874_v12  ;;  %1478 = vmatpush1.bf16.msra.mxu1 %v3878_v14 }
 0x227   : > { %1548 = vmatprep.subr.bf16.mxu0 %v3747_v35  ;;  %1589 = vmatprep.subr.bf16.mxu1 %v3750_v36 }
 0x2dc   : > { %v1329_v24 = vpop.f32.mrb[20].mxu0  ;;  %v1370_v2 = vpop.f32.mrb[20].mxu1 }
 0x2dd   : > { %v1377_v3 = vadd.f32 %v2628_v59, %v1329_v24  ;;  %v1331_v25 = vpop.f32.mrb[21].mxu0  ;;  %v1372_v26 = vpop.f32.mrb[21].mxu1  ;;  %v1379_v29 = vadd.f32 %v2630_v27, %v1370_v2 }
 0x2de   : > { %v1378_v13 = vadd.f32 %v2629_v7, %v1331_v25  ;;  %v1333_v15 = vpop.f32.mrb[22].mxu0  ;;  %v1374_v16 = vpop.f32.mrb[22].mxu1  ;;  %v1380_v22 = vadd.f32 %v2631_v21, %v1372_v26 }
 0x2df   : > { %v2632_v17 = vmul.f32 -1.442695, %v1377_v3  ;;  %v1334_v18 = vpop.f32.mrb[23].mxu0  ;;  %v1375_v19 = vpop.f32.mrb[23].mxu1  ;;  %v2639_v15 = vld [vmem:[%s2372_s18 + $0x48] sm:$0xff] }
 0x2e0   : > { %v2633_v20 = vmul.f32 -1.442695, %v1378_v13  ;;  %v2634_v28 = vmul.f32 -1.442695, %v1380_v22 }
 0x2e1   : > { %2923 = vpow2.f32 %v2632_v17 }
 0x2e2   : > { %2925 = vpow2.f32 %v2633_v20 }
 0x2e3   : > { %2927 = vpow2.f32 %v2634_v28 }
 0x2e4   : > { %2929 = vtanh.f32 %v1379_v29  ;;  %v2640_v29 = vld [vmem:[%s2372_s18 + $0x50] sm:$0xff] }
 0x2eb   : > { %v2924_v30 = vpop.eup %2923 }
 0x2ec   : > { %v2926_v31 = vpop.eup %2925  ;;  %v1384_v32 = vadd.f32 1.0, %v2924_v30 }
 0x2ed   : > { %v1390_v33 = vadd.f32 1.0, %v2926_v31  ;;  %v2928_v34 = vpop.eup %2927 }
 0x2ee   : > { %2931 = vrcp.f32 %v1384_v32  ;;  %v2930_v37 = vpop.eup %2929  ;;  %v1397_v55 = vadd.f32 1.0, %v2928_v34 }
 0x2ef   : > { %2933 = vrcp.f32 %v1390_v33 }
 0x2f0   : > { %2935 = vrcp.f32 %v1397_v55 }
 0x2f8   : > { %v2932_v42 = vpop.eup %2931 }
 0x2f9   : > { %v2934_v48 = vpop.eup %2933  ;;  %v1401_v54 = vmul.f32 %v2932_v42, %v2930_v37 }
 0x2fa   : > { %v1400_v23 = vmul.f32 %v2934_v48, %v3969_v44  ;;  %v2936_v24 = vpop.eup %2935  ;;  %v2638_v44 = vld [vmem:[%s2372_s18 + $0x40] sm:$0xff] }
 0x2fc   : > { %v4013_v59 = vadd.f32 %v1401_v54, %v1400_v23 }
 0x2fe   : > { %2937 = vtanh.f32 %v4013_v59 }
 0x308   : > { %v2938_v2 = vpop.eup %2937 }
 0x309   : > { %v1404_v3 = vmul.f32 %v2938_v2, %v2936_v24 }
 0x30b   : > { %2636 = vst [vmem:[%s2368_s7 + $0x8] sm:$0xff] %v1404_v3  ;;  %v1421_v7 = vpack.c.bf16 %v1404_v3, %v1404_v3  ;;  %s2673_s7 = smul.u32 4294967136, %s3357_s30 }
 0x30d   : > { %1455 = vmatmul.mubr.bf16.vlgmr.msra.gmra.mrb[24].mxu0 %v1421_v7  ;;  %1496 = vmatmul.mubr.bf16.vlgmr.msra.gmra.mrb[24].mxu1 %v1421_v7  ;;  %s2398_s11 = scalar_lea.vmem [#allocation2], %s2673_s7 }
 0x30e   : > { %1549 = vmatpush1.bf16.msra.mxu0 %v3753_v38  ;;  %1590 = vmatpush1.bf16.msra.mxu1 %v3756_v39 }
 0x30f   : > { %1550 = vmatprep.subr.bf16.mxu0 %v3761_v40  ;;  %1591 = vmatprep.subr.bf16.mxu1 %v3767_v43 }
 0x310   : > { %1580 = vmatprep.mubr.bf16.mxu0 %v3376_v0  ;;  %1621 = vmatprep.mubr.bf16.mxu1 %v3376_v0 }
 0x312   : > { %1551 = vmatpush1.bf16.msra.mxu0 %v3764_v41  ;;  %1592 = vmatpush1.bf16.msra.mxu1 %v3772_v45 }
 0x313   : > { %1552 = vmatprep.subr.bf16.mxu0 %v3777_v46  ;;  %1593 = vmatprep.subr.bf16.mxu1 %v3780_v47 }
 0x316   : > { %1553 = vmatpush1.bf16.msra.mxu0 %v3787_v49  ;;  %1594 = vmatpush1.bf16.msra.mxu1 %v3790_v50 }
 0x317   : > { %1554 = vmatprep.subr.bf16.mxu0 %v3795_v51  ;;  %1595 = vmatprep.subr.bf16.mxu1 %v3798_v52 }
 0x31a   : > { %1555 = vmatpush1.bf16.msra.mxu0 %v3801_v53  ;;  %1596 = vmatpush1.bf16.msra.mxu1 %v3806_v56 }
 0x31b   : > { %1556 = vmatprep.subr.bf16.mxu0 %v3811_v57  ;;  %1597 = vmatprep.subr.bf16.mxu1 %v3814_v58 }
 0x31e   : > { %1557 = vmatpush1.bf16.msra.mxu0 %v3821_v60  ;;  %1598 = vmatpush1.bf16.msra.mxu1 %v3824_v61 }
 0x31f   : > { %1558 = vmatprep.subr.bf16.mxu0 %v3829_v62  ;;  %1599 = vmatprep.subr.bf16.mxu1 %v3832_v63 }
 0x322   : > { %1559 = vmatpush1.bf16.msra.mxu0 %v3835_v1  ;;  %1600 = vmatpush1.bf16.msra.mxu1 %v3840_v4 }
 0x323   : > { %1560 = vmatprep.subr.bf16.mxu0 %v3845_v5  ;;  %1601 = vmatprep.subr.bf16.mxu1 %v3848_v6 }
 0x326   : > { %1561 = vmatpush1.bf16.msra.mxu0 %v3858_v8  ;;  %1602 = vmatpush1.bf16.msra.mxu1 %v3861_v9 }
 0x327   : > { %1562 = vmatprep.subr.bf16.mxu0 %v3866_v10  ;;  %1603 = vmatprep.subr.bf16.mxu1 %v3869_v11 }
 0x32a   : > { %1563 = vmatpush1.bf16.msra.mxu0 %v3874_v12  ;;  %1604 = vmatpush1.bf16.msra.mxu1 %v3878_v14 }
 0x32b   : > { %1674 = vmatprep.subr.bf16.mxu0 %v3747_v35  ;;  %1715 = vmatprep.subr.bf16.mxu1 %v3750_v36  ;;  %v2641_v35 = vld [vmem:[%s2372_s18 + $0x58] sm:$0xff]  ;;  %s2681_s18 = smul.u32 4294967256, %s3357_s30 }
 0x32d   : > { %s2402_s19 = scalar_lea.vmem %s3974_s27, %s2681_s18 [#allocation14] }
 0x3e0   : > { %v1456_v25 = vpop.f32.mrb[24].mxu0  ;;  %v1497_v26 = vpop.f32.mrb[24].mxu1 }
 0x3e1   : > { %v1504_v13 = vadd.f32 %v2638_v44, %v1456_v25  ;;  %v1458_v16 = vpop.f32.mrb[25].mxu0  ;;  %v1499_v17 = vpop.f32.mrb[25].mxu1  ;;  %v1506_v31 = vadd.f32 %v2640_v29, %v1497_v26 }
 0x3e2   : > { %v1505_v18 = vadd.f32 %v2639_v15, %v1458_v16  ;;  %v1460_v19 = vpop.f32.mrb[26].mxu0  ;;  %v1501_v20 = vpop.f32.mrb[26].mxu1  ;;  %v1507_v36 = vadd.f32 %v2641_v35, %v1499_v17 }
 0x3e3   : > { %v2642_v21 = vmul.f32 -1.442695, %v1504_v13  ;;  %v1461_v22 = vpop.f32.mrb[27].mxu0  ;;  %v1502_v27 = vpop.f32.mrb[27].mxu1 }
 0x3e4   : > { %v2643_v28 = vmul.f32 -1.442695, %v1505_v18  ;;  %v2644_v30 = vmul.f32 -1.442695, %v1507_v36 }
 0x3e5   : > { %2939 = vpow2.f32 %v2642_v21 }
 0x3e6   : > { %2941 = vpow2.f32 %v2643_v28 }
 0x3e7   : > { %2943 = vpow2.f32 %v2644_v30 }
 0x3e8   : > { %2945 = vtanh.f32 %v1506_v31  ;;  %v4107_v31 = vld [vmem:[%s3703_s26] ss:$16 sps:$4 sm:$0xff]  }
 0x3ef   : > { %v2940_v32 = vpop.eup %2939 }
 0x3f0   : > { %v2942_v33 = vpop.eup %2941  ;;  %v1511_v34 = vadd.f32 1.0, %v2940_v32  ;;  %v4111_v32 = vld [vmem:[%s3703_s26 + $0x8] ss:$16 sps:$4 sm:$0xff]  }
 0x3f1   : > { %v1517_v37 = vadd.f32 1.0, %v2942_v33  ;;  %v2944_v42 = vpop.eup %2943  ;;  %v4115_v33 = vld [vmem:[%s3703_s26 + $0x24] ss:$16 sps:$4 sm:$0xff]  }
 0x3f2   : > { %2947 = vrcp.f32 %v1511_v34  ;;  %v2946_v48 = vpop.eup %2945  ;;  %v1524_v24 = vadd.f32 1.0, %v2944_v42  ;;  %v4119_v34 = vld [vmem:[%s3703_s26 + $0x2c] ss:$16 sps:$4 sm:$0xff]   ;;  %v4129_v42 = vld [vmem:[%s3703_s26 + $0x28] ss:$16 sps:$4 sm:$0xff]  }
 0x3f3   : > { %2949 = vrcp.f32 %v1517_v37  ;;  %v4125_v37 = vld [vmem:[%s3703_s26 + $0x20] ss:$16 sps:$4 sm:$0xff]  }
 0x3f4   : > { %2951 = vrcp.f32 %v1524_v24  ;;  %v4149_v24 = vld [vmem:[%s3703_s26 + $0x64] ss:$16 sps:$4 sm:$0xff]  }
 0x3fc   : > { %v2948_v54 = vpop.eup %2947 }
 0x3fd   : > { %v2950_v55 = vpop.eup %2949  ;;  %v1528_v23 = vmul.f32 %v2948_v54, %v2946_v48  ;;  %v4133_v48 = vld [vmem:[%s3703_s26 + $0x44] ss:$16 sps:$4 sm:$0xff]   ;;  %v4137_v54 = vld [vmem:[%s3703_s26 + $0x4c] ss:$16 sps:$4 sm:$0xff]  }
 0x3fe   : > { %v1527_v2 = vmul.f32 %v2950_v55, %v4013_v59  ;;  %v2952_v7 = vpop.eup %2951  ;;  %v4141_v55 = vld [vmem:[%s3703_s26 + $0x40] ss:$16 sps:$4 sm:$0xff]  }
 0x400   : > { %v4054_v3 = vadd.f32 %v1528_v23, %v1527_v2  ;;  %v4145_v23 = vld [vmem:[%s3703_s26 + $0x48] ss:$16 sps:$4 sm:$0xff]   ;;  %v4153_v2 = vld [vmem:[%s3703_s26 + $0x6c] ss:$16 sps:$4 sm:$0xff]  }
 0x402   : > { %2953 = vtanh.f32 %v4054_v3 }
 0x40c   : > { %v2954_v44 = vpop.eup %2953 }
 0x40d   : > { %v1531_v25 = vmul.f32 %v2954_v44, %v2952_v7  ;;  %v4161_v7 = vld [vmem:[%s3703_s26 + $0x68] ss:$16 sps:$4 sm:$0xff]   ;;  %v4165_v44 = vld [vmem:[%s3703_s26 + $0x84] ss:$16 sps:$4 sm:$0xff]  }
 0x40f   : > { %2646 = vst [vmem:[%s2376_s23 + $0x10] sm:$0xff] %v1531_v25  ;;  %v1547_v26 = vpack.c.bf16 %v1531_v25, %v1531_v25  ;;  %v4169_v25 = vld [vmem:[%s3703_s26 + $0x8c] ss:$16 sps:$4 sm:$0xff]   ;;  %s2683_s23 = smul.u32 4294967072, %s3357_s30 }
 0x411   : > { %1581 = vmatmul.mubr.bf16.vlgmr.msra.gmra.mrb[28].mxu0 %v1547_v26  ;;  %1622 = vmatmul.mubr.bf16.vlgmr.msra.gmra.mrb[28].mxu1 %v1547_v26  ;;  %v4173_v26 = vld [vmem:[%s3703_s26 + $0x80] ss:$16 sps:$4 sm:$0xff]   ;;  %s2406_s8 = scalar_lea.vmem [#allocation2], %s2683_s23 }
 0x412   : > { %1675 = vmatpush1.bf16.msra.mxu0 %v3753_v38  ;;  %1716 = vmatpush1.bf16.msra.mxu1 %v3756_v39  ;;  %v4092_v38 = vld [vmem:[%s3703_s26 + $0x4] ss:$16 sps:$4 sm:$0xff]   ;;  %v4096_v39 = vld [vmem:[%s3703_s26 + $0xc] ss:$16 sps:$4 sm:$0xff]  }
 0x413   : > { %1676 = vmatprep.subr.bf16.mxu0 %v3761_v40  ;;  %1717 = vmatprep.subr.bf16.mxu1 %v3767_v43  ;;  %v2648_v40 = vld [vmem:[%s2379_s20 + $0x60] sm:$0xff] }
 0x414   : > { %1706 = vmatprep.mubr.bf16.mxu0 %v3376_v0  ;;  %1747 = vmatprep.mubr.bf16.mxu1 %v3376_v0 }
 0x416   : > { %1677 = vmatpush1.bf16.msra.mxu0 %v3764_v41  ;;  %1718 = vmatpush1.bf16.msra.mxu1 %v3772_v45 }
 0x417   : > { %1678 = vmatprep.subr.bf16.mxu0 %v3777_v46  ;;  %1719 = vmatprep.subr.bf16.mxu1 %v3780_v47  ;;  %v2649_v46 = vld [vmem:[%s2379_s20 + $0x68] sm:$0xff] }
 0x41a   : > { %1679 = vmatpush1.bf16.msra.mxu0 %v3787_v49  ;;  %1720 = vmatpush1.bf16.msra.mxu1 %v3790_v50 }
 0x41b   : > { %1680 = vmatprep.subr.bf16.mxu0 %v3795_v51  ;;  %1721 = vmatprep.subr.bf16.mxu1 %v3798_v52 }
 0x41e   : > { %1681 = vmatpush1.bf16.msra.mxu0 %v3801_v53  ;;  %1722 = vmatpush1.bf16.msra.mxu1 %v3806_v56 }
 0x41f   : > { %1682 = vmatprep.subr.bf16.mxu0 %v3811_v57  ;;  %1723 = vmatprep.subr.bf16.mxu1 %v3814_v58 }
 0x422   : > { %1683 = vmatpush1.bf16.msra.mxu0 %v3821_v60  ;;  %1724 = vmatpush1.bf16.msra.mxu1 %v3824_v61  ;;  %v2651_v60 = vld [vmem:[%s2379_s20 + $0x78] sm:$0xff] }
 0x423   : > { %1684 = vmatprep.subr.bf16.mxu0 %v3829_v62  ;;  %1725 = vmatprep.subr.bf16.mxu1 %v3832_v63  ;;  %v2650_v62 = vld [vmem:[%s2379_s20 + $0x70] sm:$0xff]  ;;  %s537_s20 = scalar_lea.vmem [#allocation17], %s3853_s17 }
 0x426   : > { %1685 = vmatpush1.bf16.msra.mxu0 %v3835_v1  ;;  %1726 = vmatpush1.bf16.msra.mxu1 %v3840_v4 }
 0x427   : > { %1686 = vmatprep.subr.bf16.mxu0 %v3845_v5  ;;  %1727 = vmatprep.subr.bf16.mxu1 %v3848_v6 }
 0x42a   : > { %1687 = vmatpush1.bf16.msra.mxu0 %v3858_v8  ;;  %1728 = vmatpush1.bf16.msra.mxu1 %v3861_v9 }
 0x42b   : > { %1688 = vmatprep.subr.bf16.mxu0 %v3866_v10  ;;  %1729 = vmatprep.subr.bf16.mxu1 %v3869_v11 }
 0x42e   : > { %1689 = vmatpush1.bf16.msra.mxu0 %v3874_v12  ;;  %1730 = vmatpush1.bf16.msra.mxu1 %v3878_v14 }
 0x42f   : > { %1801 = vmatprep.subr.bf16.mxu0 %v4092_v38  ;;  %1842 = vmatprep.subr.bf16.mxu1 %v4096_v39 }
 0x4e4   : > { %v1582_v41 = vpop.f32.mrb[28].mxu0  ;;  %v1623_v43 = vpop.f32.mrb[28].mxu1 }
 0x4e5   : > { %v1630_v45 = vadd.f32 %v2648_v40, %v1582_v41  ;;  %v1584_v47 = vpop.f32.mrb[29].mxu0  ;;  %v1625_v49 = vpop.f32.mrb[29].mxu1  ;;  %v1632_v1 = vadd.f32 %v2650_v62, %v1623_v43  ;;  %v4177_v40 = vld [vmem:[%s3703_s26 + $0x88] ss:$16 sps:$4 sm:$0xff]   ;;  %v4181_v41 = vld [vmem:[%s3703_s26 + $0xa4] ss:$16 sps:$4 sm:$0xff]  }
 0x4e6   : > { %v1631_v50 = vadd.f32 %v2649_v46, %v1584_v47  ;;  %v1586_v51 = vpop.f32.mrb[30].mxu0  ;;  %v1627_v52 = vpop.f32.mrb[30].mxu1  ;;  %v1633_v61 = vadd.f32 %v2651_v60, %v1625_v49  ;;  %v4185_v43 = vld [vmem:[%s3703_s26 + $0xac] ss:$16 sps:$4 sm:$0xff]  }
 0x4e7   : > { %v2652_v53 = vmul.f32 -1.442695, %v1630_v45  ;;  %v1587_v56 = vpop.f32.mrb[31].mxu0  ;;  %v1628_v57 = vpop.f32.mrb[31].mxu1  ;;  %v4189_v45 = vld [vmem:[%s3703_s26 + $0xa0] ss:$16 sps:$4 sm:$0xff]  }
 0x4e8   : > { %v2653_v58 = vmul.f32 -1.442695, %v1631_v50  ;;  %v2654_v63 = vmul.f32 -1.442695, %v1633_v61  ;;  %v1672_v52 = vld [vmem:[%s1668_s3 + $0x18] sm:$0xff]  ;;  %v1671_v56 = vld [vmem:[%s1668_s3 + $0x10] sm:$0xff] }
 0x4e9   : > { %2955 = vpow2.f32 %v2652_v53 }
 0x4ea   : > { %2957 = vpow2.f32 %v2653_v58 }
 0x4eb   : > { %2959 = vpow2.f32 %v2654_v63 }
 0x4ec   : > { %2961 = vtanh.f32 %v1632_v1 }
 0x4f3   : > { %v2956_v59 = vpop.eup %2955 }
 0x4f4   : > { %v2958_v13 = vpop.eup %2957  ;;  %v1637_v15 = vadd.f32 1.0, %v2956_v59 }
 0x4f5   : > { %v1643_v16 = vadd.f32 1.0, %v2958_v13  ;;  %v2960_v17 = vpop.eup %2959 }
 0x4f6   : > { %2963 = vrcp.f32 %v1637_v15  ;;  %v2962_v18 = vpop.eup %2961  ;;  %v1650_v22 = vadd.f32 1.0, %v2960_v17 }
 0x4f7   : > { %2965 = vrcp.f32 %v1643_v16 }
 0x4f8   : > { %2967 = vrcp.f32 %v1650_v22 }
 0x500   : > { %v2964_v19 = vpop.eup %2963 }
 0x501   : > { %v2966_v20 = vpop.eup %2965  ;;  %v1654_v21 = vmul.f32 %v2964_v19, %v2962_v18 }
 0x502   : > { %v1653_v27 = vmul.f32 %v2966_v20, %v4054_v3  ;;  %v2968_v35 = vpop.eup %2967  ;;  %v4157_v3 = vld [vmem:[%s3703_s26 + $0x60] ss:$16 sps:$4 sm:$0xff]  }
 0x504   : > { %v4101_v28 = vadd.f32 %v1654_v21, %v1653_v27 }
 0x506   : > { %2969 = vtanh.f32 %v4101_v28 }
 0x510   : > { %v2970_v36 = vpop.eup %2969 }
 0x511   : > { %v1657_v29 = vmul.f32 %v2970_v36, %v2968_v35  ;;  %v4241_v35 = vld [vmem:[%s3703_s26 + $0xc4] ss:$16 sps:$4 sm:$0xff]   ;;  %v4245_v36 = vld [vmem:[%s3703_s26 + $0xcc] ss:$16 sps:$4 sm:$0xff]  }
 0x513   : > { %2656 = vst [vmem:[%s2382_s25 + $0x18] sm:$0xff] %v1657_v29  ;;  %v1673_v30 = vpack.c.bf16 %v1657_v29, %v1657_v29  ;;  %v4249_v29 = vld [vmem:[%s3703_s26 + $0xc0] ss:$16 sps:$4 sm:$0xff]   ;;  %s2696_s25 = sshll.u32 %s3357_s30, 7 }
 0x514   : > { %s4326_s21 = scalar_lea.hbm %s4447_s6, %s2696_s25 }
 0x515   : > { %1707 = vmatmul.mubr.bf16.vlgmr.msra.gmra.mrb[32].mxu0 %v1673_v30  ;;  %1748 = vmatmul.mubr.bf16.vlgmr.msra.gmra.mrb[32].mxu1 %v1673_v30  ;;  %v4253_v30 = vld [vmem:[%s3703_s26 + $0xc8] ss:$16 sps:$4 sm:$0xff]  }
 0x516   : > { %1802 = vmatpush1.bf16.msra.mxu0 %v4107_v31  ;;  %1843 = vmatpush1.bf16.msra.mxu1 %v4111_v32 }
 0x517   : > { %1803 = vmatprep.subr.bf16.mxu0 %v4115_v33  ;;  %1844 = vmatprep.subr.bf16.mxu1 %v4119_v34 }
 0x518   : > { %1833 = vmatprep.mubr.bf16.mxu0 %v3376_v0  ;;  %1874 = vmatprep.mubr.bf16.mxu1 %v3376_v0 }
 0x51a   : > { %1804 = vmatpush1.bf16.msra.mxu0 %v4125_v37  ;;  %1845 = vmatpush1.bf16.msra.mxu1 %v4129_v42 }
 0x51b   : > { %1805 = vmatprep.subr.bf16.mxu0 %v4133_v48  ;;  %1846 = vmatprep.subr.bf16.mxu1 %v4137_v54 }
 0x51e   : > { %1806 = vmatpush1.bf16.msra.mxu0 %v4141_v55  ;;  %1847 = vmatpush1.bf16.msra.mxu1 %v4145_v23 }
 0x51f   : > { %1807 = vmatprep.subr.bf16.mxu0 %v4149_v24  ;;  %1848 = vmatprep.subr.bf16.mxu1 %v4153_v2 }
 0x522   : > { %1808 = vmatpush1.bf16.msra.mxu0 %v4157_v3  ;;  %1849 = vmatpush1.bf16.msra.mxu1 %v4161_v7 }
 0x523   : > { %1809 = vmatprep.subr.bf16.mxu0 %v4165_v44  ;;  %1850 = vmatprep.subr.bf16.mxu1 %v4169_v25 }
 0x526   : > { %1810 = vmatpush1.bf16.msra.mxu0 %v4173_v26  ;;  %1851 = vmatpush1.bf16.msra.mxu1 %v4177_v40 }
 0x527   : > { %1811 = vmatprep.subr.bf16.mxu0 %v4181_v41  ;;  %1852 = vmatprep.subr.bf16.mxu1 %v4185_v43 }
 0x52a   : > { %1812 = vmatpush1.bf16.msra.mxu0 %v4189_v45  ;;  %1853 = vmatpush1.bf16.msra.mxu1 %v3840_v4  ;;  %v1669_v4 = vld [vmem:[%s1668_s3] sm:$0xff] }
 0x52b   : > { %1813 = vmatprep.subr.bf16.mxu0 %v3845_v5  ;;  %1854 = vmatprep.subr.bf16.mxu1 %v3848_v6 }
 0x52e   : > { %1814 = vmatpush1.bf16.msra.mxu0 %v3858_v8  ;;  %1855 = vmatpush1.bf16.msra.mxu1 %v3861_v9  ;;  %v1670_v9 = vld [vmem:[%s1668_s3 + $0x8] sm:$0xff]  ;;  %s2223_s3 = sshll.u32 %s530_s12, 4  ;;  %s4334_s3 = int_to_ptr.vmem [resolvable:$true] %s2223_s3 }
 0x52f   : > { %1815 = vmatprep.subr.bf16.mxu0 %v3866_v10  ;;  %1856 = vmatprep.subr.bf16.mxu1 %v3869_v11  ;;  %s3215_s22 = scalar_lea.vmem %s4334_s3, 128 }
 0x530   : > { %p3216_p12 = scmp.ne.s32.totalorder %s4334_s3, %s3215_s22 }
 0x532   : > { %1816 = vmatpush1.bf16.msra.mxu0 %v3874_v12  ;;  %1857 = vmatpush1.bf16.msra.mxu1 %v3878_v14 }
 0x533   : > { %1928 = vmatprep.subr.bf16.mxu0 %v4092_v38  ;;  %1969 = vmatprep.subr.bf16.mxu1 %v4096_v39 }
 0x5e8   : > { %v1708_v5 = vpop.f32.mrb[32].mxu0  ;;  %v1749_v6 = vpop.f32.mrb[32].mxu1 }
 0x5e9   : > { %v1756_v8 = vadd.f32 %v1708_v5, %v1669_v4  ;;  %v1710_v10 = vpop.f32.mrb[33].mxu0  ;;  %v1751_v46 = vpop.f32.mrb[33].mxu1  ;;  %v1758_v58 = vadd.f32 %v1749_v6, %v1671_v56  ;;  %v4257_v4 = vld [vmem:[%s3703_s26 + $0xe4] ss:$16 sps:$4 sm:$0xff]   ;;  %v4261_v5 = vld [vmem:[%s3703_s26 + $0xec] ss:$16 sps:$4 sm:$0xff]  }
 0x5ea   : > { %v1757_v11 = vadd.f32 %v1710_v10, %v1670_v9  ;;  %v1712_v47 = vpop.f32.mrb[34].mxu0  ;;  %v1753_v12 = vpop.f32.mrb[34].mxu1  ;;  %v1759_v53 = vadd.f32 %v1751_v46, %v1672_v52  ;;  %v4265_v6 = vld [vmem:[%s3703_s26 + $0xe0] ss:$16 sps:$4 sm:$0xff]  }
 0x5eb   : > { %v2659_v49 = vmul.f32 -1.442695, %v1756_v8  ;;  %v1713_v14 = vpop.f32.mrb[35].mxu0  ;;  %v1754_v50 = vpop.f32.mrb[35].mxu1  ;;  %v4269_v8 = vld [vmem:[%s3703_s26 + $0xe8] ss:$16 sps:$4 sm:$0xff]  }
 0x5ec   : > { %v2660_v51 = vmul.f32 -1.442695, %v1757_v11  ;;  %v2661_v57 = vmul.f32 -1.442695, %v1759_v53  ;;  %v2664_v9 = vld [vmem:[%s2390_s29 + $0xa0] sm:$0xff]  ;;  %v2665_v47 = vld [vmem:[%s2390_s29 + $0xa8] sm:$0xff] }
 0x5ed   : > { %2971 = vpow2.f32 %v2659_v49 }
 0x5ee   : > { %2973 = vpow2.f32 %v2660_v51 }
 0x5ef   : > { %2975 = vpow2.f32 %v2661_v57 }
 0x5f0   : > { %2977 = vtanh.f32 %v1758_v58  ;;  %v2666_v58 = vld [vmem:[%s2390_s29 + $0xb0] sm:$0xff] }
 0x5f7   : > { %v2972_v60 = vpop.eup %2971 }
 0x5f8   : > { %v2974_v61 = vpop.eup %2973  ;;  %v1763_v62 = vadd.f32 1.0, %v2972_v60 }
 0x5f9   : > { %v1769_v63 = vadd.f32 1.0, %v2974_v61  ;;  %v2976_v1 = vpop.eup %2975 }
 0x5fa   : > { %2979 = vrcp.f32 %v1763_v62  ;;  %v2978_v59 = vpop.eup %2977  ;;  %v1776_v17 = vadd.f32 1.0, %v2976_v1 }
 0x5fb   : > { %2981 = vrcp.f32 %v1769_v63 }
 0x5fc   : > { %2983 = vrcp.f32 %v1776_v17 }
 0x604   : > { %v2980_v13 = vpop.eup %2979 }
 0x605   : > { %v2982_v15 = vpop.eup %2981  ;;  %v1780_v16 = vmul.f32 %v2980_v13, %v2978_v59 }
 0x606   : > { %v1779_v18 = vmul.f32 %v2982_v15, %v4101_v28  ;;  %v2984_v20 = vpop.eup %2983  ;;  %v4237_v28 = vld [vmem:[%s3703_s26 + $0xa8] ss:$16 sps:$4 sm:$0xff]   ;;  %s2671_s26 = smul.u32 4294967272, %s3357_s30  ;;  %s2236_s30 = sshll.u32 %s537_s20, 4  ;;  %s4343_s30 = int_to_ptr.vmem [resolvable:$true] %s2236_s30 }
 0x608   : > { %v4207_v19 = vadd.f32 %v1780_v16, %v1779_v18  ;;  %s2394_s13 = scalar_lea.vmem %s3974_s27, %s2671_s26 [#allocation14]  ;;  %s2207_s26 = sshll.u32 %s3974_s27, 4  ;;  %s4336_s26 = int_to_ptr.vmem [resolvable:$true] %s2207_s26 }
 0x60a   : > { %2985 = vtanh.f32 %v4207_v19 }
 0x614   : > { %v2986_v21 = vpop.eup %2985 }
 0x615   : > { %v1783_v22 = vmul.f32 %v2986_v21, %v2984_v20 }
 0x617   : > { %1788 = vst [vmem:[%s1787_s1] sm:$0xff] %v1783_v22  ;;  %v1800_v27 = vpack.c.bf16 %v1783_v22, %v1783_v22 }
 0x619   : > { %1834 = vmatmul.mubr.bf16.vlgmr.msra.gmra.mrb[36].mxu0 %v1800_v27  ;;  %1875 = vmatmul.mubr.bf16.vlgmr.msra.gmra.mrb[36].mxu1 %v1800_v27 }
 0x61a   : > { %1929 = vmatpush1.bf16.msra.mxu0 %v4107_v31  ;;  %1970 = vmatpush1.bf16.msra.mxu1 %v4111_v32 }
 0x61b   : > { %1930 = vmatprep.subr.bf16.mxu0 %v4115_v33  ;;  %1971 = vmatprep.subr.bf16.mxu1 %v4119_v34 }
 0x61c   : > { %1960 = vmatprep.mubr.bf16.mxu0 %v3376_v0  ;;  %2001 = vmatprep.mubr.bf16.mxu1 %v3376_v0 }
 0x61e   : > { %1931 = vmatpush1.bf16.msra.mxu0 %v4125_v37  ;;  %1972 = vmatpush1.bf16.msra.mxu1 %v4129_v42 }
 0x61f   : > { %1932 = vmatprep.subr.bf16.mxu0 %v4133_v48  ;;  %1973 = vmatprep.subr.bf16.mxu1 %v4137_v54 }
 0x622   : > { %1933 = vmatpush1.bf16.msra.mxu0 %v4141_v55  ;;  %1974 = vmatpush1.bf16.msra.mxu1 %v4145_v23 }
 0x623   : > { %1934 = vmatprep.subr.bf16.mxu0 %v4149_v24  ;;  %1975 = vmatprep.subr.bf16.mxu1 %v4153_v2 }
 0x626   : > { %1935 = vmatpush1.bf16.msra.mxu0 %v4157_v3  ;;  %1976 = vmatpush1.bf16.msra.mxu1 %v4161_v7 }
 0x627   : > { %1936 = vmatprep.subr.bf16.mxu0 %v4165_v44  ;;  %1977 = vmatprep.subr.bf16.mxu1 %v4169_v25 }
 0x62a   : > { %1937 = vmatpush1.bf16.msra.mxu0 %v4173_v26  ;;  %1978 = vmatpush1.bf16.msra.mxu1 %v4177_v40 }
 0x62b   : > { %1938 = vmatprep.subr.bf16.mxu0 %v4181_v41  ;;  %1979 = vmatprep.subr.bf16.mxu1 %v4185_v43 }
 0x62e   : > { %1939 = vmatpush1.bf16.msra.mxu0 %v4189_v45  ;;  %1980 = vmatpush1.bf16.msra.mxu1 %v4237_v28 }
 0x62f   : > { %1940 = vmatprep.subr.bf16.mxu0 %v4241_v35  ;;  %1981 = vmatprep.subr.bf16.mxu1 %v4245_v36 }
 0x632   : > { %1941 = vmatpush1.bf16.msra.mxu0 %v4249_v29  ;;  %1982 = vmatpush1.bf16.msra.mxu1 %v4253_v30 }
 0x633   : > { %1942 = vmatprep.subr.bf16.mxu0 %v4257_v4  ;;  %1983 = vmatprep.subr.bf16.mxu1 %v4261_v5 }
 0x636   : > { %1943 = vmatpush1.bf16.msra.mxu0 %v4265_v6  ;;  %1984 = vmatpush1.bf16.msra.mxu1 %v4269_v8 }
 0x637   : > { %2055 = vmatprep.subr.bf16.mxu0 %v4092_v38  ;;  %2096 = vmatprep.subr.bf16.mxu1 %v4096_v39  ;;  %v2667_v38 = vld [vmem:[%s2390_s29 + $0xb8] sm:$0xff]  ;;  %s4508_s29 = sld [smem:[#allocation26_spill]] }
 0x63d   : > { %p4511_p1 = scmp.ne.s32.totalorder %s4508_s29, 0 }
 0x63f   : > { %p3217_p0 = pnand %p3216_p12, %p4511_p1 }
 0x641   : > { %p3218_p4 = pneg %p3217_p0 }
 0x6ec   : > { %v1835_v10 = vpop.f32.mrb[36].mxu0  ;;  %v1876_v46 = vpop.f32.mrb[36].mxu1 }
 0x6ed   : > { %v1883_v11 = vadd.f32 %v2664_v9, %v1835_v10  ;;  %v1837_v12 = vpop.f32.mrb[37].mxu0  ;;  %v1878_v49 = vpop.f32.mrb[37].mxu1  ;;  %v1885_v61 = vadd.f32 %v2666_v58, %v1876_v46 }
 0x6ee   : > { %v1884_v14 = vadd.f32 %v2665_v47, %v1837_v12  ;;  %v1839_v50 = vpop.f32.mrb[38].mxu0  ;;  %v1880_v51 = vpop.f32.mrb[38].mxu1  ;;  %v1886_v39 = vadd.f32 %v2667_v38, %v1878_v49  ;;  %v2684_v49 = vld [vmem:[%s2406_s8 + $0xe0] sm:$0xff] }
 0x6ef   : > { %v2668_v52 = vmul.f32 -1.442695, %v1883_v11  ;;  %v1840_v53 = vpop.f32.mrb[39].mxu0  ;;  %v1881_v56 = vpop.f32.mrb[39].mxu1 }
 0x6f0   : > { %v2669_v57 = vmul.f32 -1.442695, %v1884_v14  ;;  %v2670_v60 = vmul.f32 -1.442695, %v1886_v39 }
 0x6f1   : > { %2987 = vpow2.f32 %v2668_v52  ;;  %v2685_v52 = vld [vmem:[%s2406_s8 + $0xe8] sm:$0xff] }
 0x6f2   : > { %2989 = vpow2.f32 %v2669_v57 }
 0x6f3   : > { %2991 = vpow2.f32 %v2670_v60 }
 0x6f4   : > { %2993 = vtanh.f32 %v1885_v61 }
 0x6fb   : > { %v2988_v62 = vpop.eup %2987 }
 0x6fc   : > { %v2990_v63 = vpop.eup %2989  ;;  %v1890_v1 = vadd.f32 1.0, %v2988_v62 }
 0x6fd   : > { %v1896_v59 = vadd.f32 1.0, %v2990_v63  ;;  %v2992_v13 = vpop.eup %2991  ;;  %v2687_v63 = vld [vmem:[%s2406_s8 + $0xf8] sm:$0xff] }
 0x6fe   : > { %2995 = vrcp.f32 %v1890_v1  ;;  %v2994_v15 = vpop.eup %2993  ;;  %v1903_v20 = vadd.f32 1.0, %v2992_v13 }
 0x6ff   : > { %2997 = vrcp.f32 %v1896_v59  ;;  %v2686_v59 = vld [vmem:[%s2406_s8 + $0xf0] sm:$0xff]  ;;  %s2183_s8 = scalar_lea.sflag [#allocation16], %s3689_s24 }
 0x700   : > { %2999 = vrcp.f32 %v1903_v20 }
 0x708   : > { %v2996_v16 = vpop.eup %2995 }
 0x709   : > { %v2998_v17 = vpop.eup %2997  ;;  %v1907_v18 = vmul.f32 %v2996_v16, %v2994_v15 }
 0x70a   : > { %v1906_v21 = vmul.f32 %v2998_v17, %v4207_v19  ;;  %v3000_v27 = vpop.eup %2999 }
 0x70c   : > { %v4276_v22 = vadd.f32 %v1907_v18, %v1906_v21 }
 0x70e   : > { %3001 = vtanh.f32 %v4276_v22 }
 0x718   : > { %v3002_v9 = vpop.eup %3001 }
 0x719   : > { %v1910_v10 = vmul.f32 %v3002_v9, %v3000_v27 }
 0x71b   : > { %2672 = vst [vmem:[%s2394_s13 + $0x28] sm:$0xff] %v1910_v10  ;;  %v1927_v46 = vpack.c.bf16 %v1910_v10, %v1910_v10 }
 0x71d   : > { %1961 = vmatmul.mubr.bf16.vlgmr.msra.gmra.mrb[40].mxu0 %v1927_v46  ;;  %2002 = vmatmul.mubr.bf16.vlgmr.msra.gmra.mrb[40].mxu1 %v1927_v46 }
 0x71e   : > { %2056 = vmatpush1.bf16.msra.mxu0 %v4107_v31  ;;  %2097 = vmatpush1.bf16.msra.mxu1 %v4111_v32 }
 0x71f   : > { %2057 = vmatprep.subr.bf16.mxu0 %v4115_v33  ;;  %2098 = vmatprep.subr.bf16.mxu1 %v4119_v34  ;;  %v2675_v34 = vld [vmem:[%s2398_s11 + $0xc8] sm:$0xff] }
 0x720   : > { %2087 = vmatprep.mubr.bf16.mxu0 %v3376_v0  ;;  %2128 = vmatprep.mubr.bf16.mxu1 %v3376_v0  ;;  %v2674_v0 = vld [vmem:[%s2398_s11 + $0xc0] sm:$0xff] }
 0x722   : > { %2058 = vmatpush1.bf16.msra.mxu0 %v4125_v37  ;;  %2099 = vmatpush1.bf16.msra.mxu1 %v4129_v42 }
 0x723   : > { %2059 = vmatprep.subr.bf16.mxu0 %v4133_v48  ;;  %2100 = vmatprep.subr.bf16.mxu1 %v4137_v54 }
 0x726   : > { %2060 = vmatpush1.bf16.msra.mxu0 %v4141_v55  ;;  %2101 = vmatpush1.bf16.msra.mxu1 %v4145_v23 }
 0x727   : > { %2061 = vmatprep.subr.bf16.mxu0 %v4149_v24  ;;  %2102 = vmatprep.subr.bf16.mxu1 %v4153_v2 }
 0x72a   : > { %2062 = vmatpush1.bf16.msra.mxu0 %v4157_v3  ;;  %2103 = vmatpush1.bf16.msra.mxu1 %v4161_v7  ;;  %v2677_v7 = vld [vmem:[%s2398_s11 + $0xd8] sm:$0xff] }
 0x72b   : > { %2063 = vmatprep.subr.bf16.mxu0 %v4165_v44  ;;  %2104 = vmatprep.subr.bf16.mxu1 %v4169_v25  ;;  %v2676_v25 = vld [vmem:[%s2398_s11 + $0xd0] sm:$0xff]  ;;  %s4509_s11 = sld [smem:[#allocation31_spill]] }
 0x72e   : > { %2064 = vmatpush1.bf16.msra.mxu0 %v4173_v26  ;;  %2105 = vmatpush1.bf16.msra.mxu1 %v4177_v40 }
 0x72f   : > { %2065 = vmatprep.subr.bf16.mxu0 %v4181_v41  ;;  %2106 = vmatprep.subr.bf16.mxu1 %v4185_v43 }
 0x731   : > { %s4332_s18 = scalar_lea.hbm %s4509_s11, %s2696_s25 }
 0x732   : > { %2066 = vmatpush1.bf16.msra.mxu0 %v4189_v45  ;;  %2107 = vmatpush1.bf16.msra.mxu1 %v4237_v28 }
 0x733   : > { %2067 = vmatprep.subr.bf16.mxu0 %v4241_v35  ;;  %2108 = vmatprep.subr.bf16.mxu1 %v4245_v36 }
 0x736   : > { %2068 = vmatpush1.bf16.msra.mxu0 %v4249_v29  ;;  %2109 = vmatpush1.bf16.msra.mxu1 %v4253_v30 }
 0x737   : > { %2069 = vmatprep.subr.bf16.mxu0 %v4257_v4  ;;  %2110 = vmatprep.subr.bf16.mxu1 %v4261_v5 }
 0x73a   : > { %2070 = vmatpush1.bf16.msra.mxu0 %v4265_v6  ;;  %2111 = vmatpush1.bf16.msra.mxu1 %v4269_v8 }
 0x7f0   : > { %v1962_v31 = vpop.f32.mrb[40].mxu0  ;;  %v2003_v32 = vpop.f32.mrb[40].mxu1 }
 0x7f1   : > { %v2010_v33 = vadd.f32 %v2674_v0, %v1962_v31  ;;  %v1964_v37 = vpop.f32.mrb[41].mxu0  ;;  %v2005_v42 = vpop.f32.mrb[41].mxu1  ;;  %v2012_v40 = vadd.f32 %v2676_v25, %v2003_v32 }
 0x7f2   : > { %v2011_v48 = vadd.f32 %v2675_v34, %v1964_v37  ;;  %v1966_v54 = vpop.f32.mrb[42].mxu0  ;;  %v2007_v55 = vpop.f32.mrb[42].mxu1  ;;  %v2013_v44 = vadd.f32 %v2677_v7, %v2005_v42 }
 0x7f3   : > { %v2678_v23 = vmul.f32 -1.442695, %v2010_v33  ;;  %v1967_v24 = vpop.f32.mrb[43].mxu0  ;;  %v2008_v2 = vpop.f32.mrb[43].mxu1 }
 0x7f4   : > { %v2679_v3 = vmul.f32 -1.442695, %v2011_v48  ;;  %v2680_v26 = vmul.f32 -1.442695, %v2013_v44 }
 0x7f5   : > { %3003 = vpow2.f32 %v2678_v23 }
 0x7f6   : > { %3005 = vpow2.f32 %v2679_v3 }
 0x7f7   : > { %3007 = vpow2.f32 %v2680_v26 }
 0x7f8   : > { %3009 = vtanh.f32 %v2012_v40 }
 0x7ff   : > { %v3004_v41 = vpop.eup %3003 }
 0x800   : > { %v3006_v43 = vpop.eup %3005  ;;  %v2017_v45 = vadd.f32 1.0, %v3004_v41 }
 0x801   : > { %v2023_v19 = vadd.f32 1.0, %v3006_v43  ;;  %v3008_v28 = vpop.eup %3007 }
 0x802   : > { %3011 = vrcp.f32 %v2017_v45  ;;  %v3010_v35 = vpop.eup %3009  ;;  %v2030_v4 = vadd.f32 1.0, %v3008_v28 }
 0x803   : > { %3013 = vrcp.f32 %v2023_v19 }
 0x804   : > { %3015 = vrcp.f32 %v2030_v4 }
 0x80c   : > { %v3012_v36 = vpop.eup %3011 }
 0x80d   : > { %v3014_v29 = vpop.eup %3013  ;;  %v2034_v30 = vmul.f32 %v3012_v36, %v3010_v35 }
 0x80e   : > { %v2033_v5 = vmul.f32 %v3014_v29, %v4276_v22  ;;  %v3016_v8 = vpop.eup %3015 }
 0x810   : > { %v2035_v6 = vadd.f32 %v2034_v30, %v2033_v5 }
 0x812   : > { %3017 = vtanh.f32 %v2035_v6 }
 0x81c   : > { %v3018_v11 = vpop.eup %3017 }
 0x81d   : > { %v2037_v47 = vmul.f32 %v3018_v11, %v3016_v8 }
 0x81f   : > { %2682 = vst [vmem:[%s2402_s19 + $0x30] sm:$0xff] %v2037_v47  ;;  %v2054_v12 = vpack.c.bf16 %v2037_v47, %v2037_v47  ;;  %s4510_s19 = sld [smem:[#allocation32_spill]] }
 0x821   : > { %2088 = vmatmul.mubr.bf16.vlgmr.msra.gmra.mrb[44].mxu0 %v2054_v12  ;;  %2129 = vmatmul.mubr.bf16.vlgmr.msra.gmra.mrb[44].mxu1 %v2054_v12 }
 0x825   : > { %s4341_s23 = scalar_lea.hbm %s4510_s19, %s2696_s25 }
 0x8f4   : > { %v2089_v14 = vpop.f32.mrb[44].mxu0  ;;  %v2130_v50 = vpop.f32.mrb[44].mxu1 }
 0x8f5   : > { %v2137_v51 = vadd.f32 %v2684_v49, %v2089_v14  ;;  %v2091_v53 = vpop.f32.mrb[45].mxu0  ;;  %v2132_v56 = vpop.f32.mrb[45].mxu1  ;;  %v2139_v15 = vadd.f32 %v2686_v59, %v2130_v50 }
 0x8f6   : > { %v2138_v57 = vadd.f32 %v2685_v52, %v2091_v53  ;;  %v2093_v38 = vpop.f32.mrb[46].mxu0  ;;  %v2134_v39 = vpop.f32.mrb[46].mxu1  ;;  %v2140_v1 = vadd.f32 %v2687_v63, %v2132_v56 }
 0x8f7   : > { %v2688_v58 = vmul.f32 -1.442695, %v2137_v51  ;;  %v2094_v60 = vpop.f32.mrb[47].mxu0  ;;  %v2135_v61 = vpop.f32.mrb[47].mxu1 }
 0x8f8   : > { %v2689_v62 = vmul.f32 -1.442695, %v2138_v57  ;;  %v2690_v13 = vmul.f32 -1.442695, %v2140_v1 }
 0x8f9   : > { %3019 = vpow2.f32 %v2688_v58 }
 0x8fa   : > { %3021 = vpow2.f32 %v2689_v62 }
 0x8fb   : > { %3023 = vpow2.f32 %v2690_v13 }
 0x8fc   : > { %3025 = vtanh.f32 %v2139_v15 }
 0x903   : > { %v3020_v16 = vpop.eup %3019 }
 0x904   : > { %v3022_v17 = vpop.eup %3021  ;;  %v2144_v18 = vadd.f32 1.0, %v3020_v16 }
 0x905   : > { %v2150_v20 = vadd.f32 1.0, %v3022_v17  ;;  %v3024_v21 = vpop.eup %3023 }
 0x906   : > { %3027 = vrcp.f32 %v2144_v18  ;;  %v3026_v22 = vpop.eup %3025  ;;  %v2157_v46 = vadd.f32 1.0, %v3024_v21 }
 0x907   : > { %3029 = vrcp.f32 %v2150_v20 }
 0x908   : > { %3031 = vrcp.f32 %v2157_v46 }
 0x910   : > { %v3028_v27 = vpop.eup %3027 }
 0x911   : > { %v3030_v9 = vpop.eup %3029  ;;  %v2161_v10 = vmul.f32 %v3028_v27, %v3026_v22 }
 0x912   : > { %v2160_v0 = vmul.f32 %v3030_v9, %v2035_v6  ;;  %v3032_v32 = vpop.eup %3031 }
 0x914   : > { %v2162_v31 = vadd.f32 %v2161_v10, %v2160_v0 }
 0x916   : > { %3033 = vtanh.f32 %v2162_v31  ;;  %2176 = vst [vmem:[%s537_s20] sm:$0xff] %v2162_v31  ;;  %s3377_s20 = smov [#allocation15]  }
 0x917   : > { %s3219_s16 = sshll.u32 %s3377_s20, 4  ;;  %s3220_s16 = int_to_ptr.vmem [resolvable:$false] %s3219_s16 }
 0x918   : > { %s3221_s1 = scalar_lea.vmem %s3220_s16, 256  ;;  %p3222_p3 = scmp.lt.s32.totalorder %s4334_s3, %s3220_s16 }
 0x919   : > { %p3223_p13 = scmp.lt.s32.totalorder %s3221_s1, %s3215_s22 }
 0x91b   : > { %p3224_p2 = por %p3223_p13, %p3222_p3 }
 0x91d   : > { %p3225_p9 = pnand %p3224_p2, %p3218_p4 }
 0x920   : > { %v3034_v33 = vpop.eup %3033 }
 0x921   : > { %v2164_v34 = vmul.f32 %v3034_v33, %v3032_v32 }
 0x923   : > { %2174 = vst [vmem:[%s530_s12] sm:$0xff] %v2164_v34  ;;  %2692 = vst [vmem:[%s2410_s14 + $0x38] sm:$0xff] %v2164_v34 }
 0x924   : > { %3228 = shalt.err (!%p3225_p9)
}
 0x925   : > { %s3229_s25 = scalar_lea.hbm %s4332_s18, 128  ;;  %s3233_s13 = scalar_lea.hbm %s4509_s11, 256 }
 0x926   : > { %p3230_p11 = scmp.ne.s32.totalorder %s4332_s18, %s3229_s25  ;;  %p3234_p6 = scmp.lt.u32.totalorder %s4332_s18, %s4509_s11 }
 0x927   : > { %p3235_p10 = scmp.lt.u32.totalorder %s3233_s13, %s3229_s25  ;;  %p3237_p12 = scmp.lt.u32.totalorder %s3229_s25, %s4332_s18 }
 0x928   : > { %p3231_p5 = pnand %p3230_p11, %p4511_p1 }
 0x929   : > { %p3236_p7 = por %p3235_p10, %p3234_p6 }
 0x92a   : > { %p3232_p8 = pneg %p3231_p5 }
 0x92b   : > { %p3238_p0 = por %p3237_p12, %p3236_p7 }
 0x92d   : > { %p3239_p4 = pnand %p3238_p0, %p3232_p8 }
 0x92f   : > { %3242 = shalt.err (!%p3239_p4)
}
 0x930   : > { %2719 = dma.vmem_to_hbm [thread:$0]  (%p4511_p1), %s4334_s3, 128, %s4332_s18, %s2183_s8  }
 0x931   : > { %s2178_s27 = scalar_lea.sflag [#allocation7], %s3692_s15  ;;  %s3243_s22 = scalar_lea.vmem %s4336_s26, 1024 }
 0x932   : > { %p3244_p3 = scmp.ne.s32.totalorder %s4336_s26, %s3243_s22  ;;  %s3378_s20 = smov [#allocation14]  }
 0x933   : > { %s3247_s16 = sshll.u32 %s3378_s20, 4  ;;  %s3248_s16 = int_to_ptr.vmem [resolvable:$false] %s3247_s16 }
 0x934   : > { %p3245_p13 = pnand %p3244_p3, %p4511_p1  ;;  %s3249_s1 = scalar_lea.vmem %s3248_s16, 2048 }
 0x935   : > { %p3250_p9 = scmp.lt.s32.totalorder %s4336_s26, %s3248_s16  ;;  %p3251_p11 = scmp.lt.s32.totalorder %s3249_s1, %s3243_s22 }
 0x936   : > { %p3246_p2 = pneg %p3245_p13 }
 0x937   : > { %p3252_p5 = por %p3251_p11, %p3250_p9 }
 0x939   : > { %p3253_p8 = pnand %p3252_p5, %p3246_p2 }
 0x93b   : > { %3256 = shalt.err (!%p3253_p8)
}
 0x93c   : > { %s3257_s3 = scalar_lea.hbm %s4326_s21, 1024  ;;  %s3261_s14 = scalar_lea.hbm %s4447_s6, 2048 }
 0x93d   : > { %p3258_p6 = scmp.ne.s32.totalorder %s4326_s21, %s3257_s3  ;;  %p3262_p12 = scmp.lt.u32.totalorder %s4326_s21, %s4447_s6 }
 0x93e   : > { %p3263_p0 = scmp.lt.u32.totalorder %s3261_s14, %s3257_s3  ;;  %p3265_p3 = scmp.lt.u32.totalorder %s3257_s3, %s4326_s21 }
 0x93f   : > { %p3259_p10 = pnand %p3258_p6, %p4511_p1 }
 0x940   : > { %p3264_p4 = por %p3263_p0, %p3262_p12 }
 0x941   : > { %p3260_p7 = pneg %p3259_p10 }
 0x942   : > { %p3266_p13 = por %p3265_p3, %p3264_p4 }
 0x944   : > { %p3267_p2 = pnand %p3266_p13, %p3260_p7 }
 0x946   : > { %3270 = shalt.err (!%p3267_p2)
}
 0x947   : > { %s3379_s7 = smov 128   ;;  %s3380_s17 = smov 256  }
 0x948   : > { %s3381_s22 = smov 8   ;;  %s3271_s20 = scalar_lea.vmem %s4343_s30, 128 }
 0x949   : > { %2718 = dma.vmem_to_hbm [thread:$0]  (%p4511_p1), %s4336_s26, 1024, %s4326_s21, %s2178_s27, %s3379_s7, %s3380_s17, %s3381_s22  }
 0x94a   : > { %p3272_p9 = scmp.ne.s32.totalorder %s4343_s30, %s3271_s20  ;;  %s3382_s16 = smov [#allocation17]  }
 0x94b   : > { %s3275_s1 = sshll.u32 %s3382_s16, 4  ;;  %s3276_s1 = int_to_ptr.vmem [resolvable:$false] %s3275_s1 }
 0x94c   : > { %p3273_p11 = pnand %p3272_p9, %p4511_p1  ;;  %s3277_s3 = scalar_lea.vmem %s3276_s1, 256 }
 0x94d   : > { %p3278_p8 = scmp.lt.s32.totalorder %s4343_s30, %s3276_s1  ;;  %p3279_p6 = scmp.lt.s32.totalorder %s3277_s3, %s3271_s20 }
 0x94e   : > { %p3274_p5 = pneg %p3273_p11 }
 0x94f   : > { %p3280_p10 = por %p3279_p6, %p3278_p8 }
 0x951   : > { %p3281_p7 = pnand %p3280_p10, %p3274_p5 }
 0x953   : > { %3284 = shalt.err (!%p3281_p7)
}
 0x954   : > { %s3285_s15 = scalar_lea.hbm %s4341_s23, 128  ;;  %s3289_s27 = scalar_lea.hbm %s4510_s19, 256 }
 0x955   : > { %p3286_p12 = scmp.ne.s32.totalorder %s4341_s23, %s3285_s15  ;;  %p3290_p3 = scmp.lt.u32.totalorder %s4341_s23, %s4510_s19 }
 0x956   : > { %p3291_p13 = scmp.lt.u32.totalorder %s3289_s27, %s3285_s15  ;;  %p3293_p9 = scmp.lt.u32.totalorder %s3285_s15, %s4341_s23 }
 0x957   : > { %p3287_p0 = pnand %p3286_p12, %p4511_p1 }
 0x958   : > { %p3292_p2 = por %p3291_p13, %p3290_p3 }
 0x959   : > { %p3288_p4 = pneg %p3287_p0 }
 0x95a   : > { %p3294_p11 = por %p3293_p9, %p3292_p2 }
 0x95c   : > { %p3295_p5 = pnand %p3294_p11, %p3288_p4 }
 0x95e   : > { %3298 = shalt.err (!%p3295_p5)
}
 0x95f   : > { %2720 = dma.vmem_to_hbm [thread:$0]  (%p4511_p1), %s4343_s30, 128, %s4341_s23, %s2183_s8  }
 0x960 PF: > { %s4512_s14 = sld [smem:[#allocation23_spill]]  ;;  %s4513_s12 = sld [smem:[#allocation28_spill]] }
 0x961   : > { %p4515_p6 = scmp.ge.s32.totalorder %s3365_s10, 2 }
 0x966   : > { %s2248_s13 = sand.u32 1, %s4512_s14   ;;  %p4514_p8 = scmp.ne.s32.totalorder %s4513_s12, 0 }
 0x967   : > { %s2249_s7 = scalar_lea.sflag [#allocation7], %s2248_s13 }
 0x968   : > { %p2741_p10 = pnand %p4515_p6, %p4514_p8 }
 0x96a   : > { %3336 = dma.done.wait (!%p2741_p10), %s2249_s7, 1024  }
 0x96b   : > { %3338 = vsyncadd (!%p2741_p10), %s2249_s7, 4294966272  ;;  %s4516_s17 = sadd.s32 4294967294, %s3365_s10  }
 0x96c   : > { %s2257_s22 = sand.u32 1, %s4516_s17  }
 0x96d   : > { %s2258_s29 = scalar_lea.sflag [#allocation16], %s2257_s22 }
 0x96e   : > { %3340 = dma.done.wait (!%p2741_p10), %s2258_s29, 256  }
 0x96f   : > { %3342 = vsyncadd (!%p2741_p10), %s2258_s29, 4294967040  ;;  %s34_s10 = sadd.s32 1, %s3365_s10   ;;  %s4517_s24 = sld [smem:[#allocation24_spill]] }
 0x970   : > { %p31_p1 = scmp.ge.s32.totalorder %s34_s10, 4   ;;  %s4518_s29 = sld [smem:[#allocation27_spill]] }
 0x971   : > { %s4519_s23 = sld [smem:[#allocation25_spill]]  ;;  %s4520_s27 = smov %s3349_s28 }
 0x972   : > { %s4522_s30 = smov %s3361_s9  ;;  %33 = sbr.rel (!%p31_p1) target bundleno = 17 (0x11), region = 196 }
 0x975   : > { %s4521_s28 = smov %s4517_s24 }
 0x977   : > { %s4523_s9 = smov %s4519_s23 }
 0x979   :  { %2272 = vsyncpa [#allocation6], 1 }
 0x97a   :  { %2274 = vsyncpa [#allocation6 + $0x1], 1 }
 0x97b   :  { %2275 = vsyncpa [#allocation9], 1 }
 0x97c   :  { %2277 = vsyncpa [#allocation9 + $0x1], 1 }
 0x97d   :  { %2278 = vsyncpa [#allocation12], 1 }
 0x97e   :  { %2280 = vsyncpa [#allocation12 + $0x1], 1 }
 0x97f   :  { %2281 = vsyncpa [#allocation7], 1 }
 0x980   :  { %2283 = vsyncpa [#allocation7 + $0x1], 1 }
 0x981   :  { %2284 = vsyncpa [#allocation16], 1 }
 0x982   :  { %2286 = vsyncpa [#allocation16 + $0x1], 1 }

</bundles_post_ra>
